<compile_context>
chip_gen: v7x
topology: tpu7x:2x2x1
jax: 0.10.0
libtpu: 0.0.40
codegen_flags: <defaults>
</compile_context>

<pallas_src>
import functools

import jax
import jax.numpy as jnp
from jax.experimental import pallas as pl
from jax.experimental.pallas import tpu as pltpu


def _round_up(x, m):
    return ((x + m - 1) // m) * m


def _vmem_capacity_bytes():
    """Physical VMEM per TensorCore; falls back to the v7x (tightest) 64 MiB."""
    try:
        cap = getattr(pltpu.get_tpu_info(), "vmem_capacity_bytes", None)
        if cap:
            return int(cap)
    except Exception:
        pass
    return 64 * 1024 * 1024


def _san_fused_kernel(*refs, num_stacks):
    """All attention stacks for one (bt, ...) batch tile, fully in VMEM.

    Ref layout (inputs in in_specs order, then the output):
      mask_ref : (bt, N)    f32   additive logit bias (0 valid / -1e30 masked)
      ques_ref : (bt, Dq)   bf16  question features
      img_ref  : (bt, N, F) bf16  image features
      wq0,bq0,wi0,wh0 : stack-0 weights (Wq/Wi bf16, bq/wh f32)
      [wqs,bqs,wis,whs] : stacked weights for stacks 1..S-1 (present iff S > 1)
      bh_ref   : (S,) f32 in SMEM  fc13 biases
      o_ref    : (bt, A) f32
    """
    if num_stacks > 1:
        (mask_ref, ques_ref, img_ref, wq0_ref, bq0_ref, wi0_ref, wh0_ref,
         wqs_ref, bqs_ref, wis_ref, whs_ref, bh_ref, o_ref) = refs
    else:
        (mask_ref, ques_ref, img_ref, wq0_ref, bq0_ref, wi0_ref, wh0_ref,
         bh_ref, o_ref) = refs

    img = img_ref[...]                       # (bt, N, F) bf16
    mask_bias = mask_ref[...]                # (bt, N) f32
    bt, n, f = img.shape
    a = wq0_ref.shape[1]

    # Regions flattened once for every stack's image projection; layout-free
    # because n % 8 == 0 (sublane groups stay intact).
    img2d = img.reshape(bt * n, f)

    def one_stack(u_prev, wq, bq, wi, wh, bh, base_is_q):
        # Question / state projection (MXU, bf16 x bf16 -> f32 accumulate).
        q = jnp.dot(u_prev.astype(jnp.bfloat16), wq,
                    preferred_element_type=jnp.float32) + bq           # (bt, A)
        # Image projection: one lane-dense matmul over all regions.
        im = jnp.dot(img2d, wi,
                     preferred_element_type=jnp.float32).reshape(bt, n, a)
        # Joint embedding + fc13 attention logits (lane reduction).
        # TODO(synk): training-mode dropout on h is omitted (identity at inference).
        h = jnp.tanh(q[:, None, :] + im)                               # (bt, N, A)
        logits = jnp.sum(h * wh, axis=2) + bh + mask_bias              # (bt, N)
        # Softmax over regions; reciprocal on the EUP (approx) instead of a divide.
        m = jnp.max(logits, axis=1, keepdims=True)
        e = jnp.exp(logits - m)
        p = e * pl.reciprocal(jnp.sum(e, axis=1, keepdims=True), approx=True)
        # Attention-weighted sum of image embeddings + residual update.
        ws = jnp.sum(im * p[:, :, None], axis=1)                       # (bt, A)
        return (q if base_is_q else u_prev) + ws

    u = one_stack(ques_ref[...], wq0_ref[...], bq0_ref[...], wi0_ref[...],
                  wh0_ref[...], bh_ref[0], base_is_q=True)
    for s in range(num_stacks - 1):             # static unroll over stacks
        u = one_stack(u, wqs_ref[s], bqs_ref[s], wis_ref[s], whs_ref[s],
                      bh_ref[s + 1], base_is_q=False)

    o_ref[...] = u.astype(o_ref.dtype)


def stacked_attention_fused(img_feat, ques_feat, kp, *, v_mask=True):
    """Fused SAN forward (all stacks in one pallas_call). Returns (B, att_size) f32."""
    num_stacks = kp["num_stacks"]
    A = kp["att_size"]
    B, N, F = img_feat.shape
    Dq = ques_feat.shape[1]

    dq_pad, a_pad = kp["wq0"].shape
    f_pad = kp["wi0"].shape[0]
    n_pad = _round_up(N, 8)

    # ---- batch tile from a VMEM budget (v7x: only 64 MiB per TensorCore) ----
    wbytes = (dq_pad + f_pad) * a_pad * 2                        # stack-0 bf16 matmul weights
    wbytes += (num_stacks - 1) * (a_pad + f_pad) * a_pad * 2     # extra-stack bf16 weights
    wbytes += num_stacks * (2 * a_pad + 1) * 4                   # bq / wh / bh (f32)
    wbytes *= 2                                                  # pipeline double-buffering

    def footprint(bt):
        img_blk = 2 * bt * n_pad * f_pad * 2                     # double-buffered bf16 img tile
        small_io = 2 * (bt * n_pad * 4 + bt * dq_pad * 2 + bt * a_pad * 4)
        inter = 3 * bt * n_pad * a_pad * 4                       # im / h / softmax temps (f32)
        return img_blk + small_io + inter + wbytes

    cap = _vmem_capacity_bytes()
    bt = min(_round_up(B, 8), 128)
    while bt > 8 and footprint(bt) > int(0.7 * cap):
        bt = max(8, (bt // 2) // 8 * 8)
    b_pad = _round_up(B, bt)
    grid = (b_pad // bt,)
    vmem_limit = int(min(0.85 * cap, max(2 * footprint(bt), 32 * 1024 * 1024)))

    # ---- padded / cast operands (bf16 matmul inputs, zero padding) ----
    img_p = jnp.pad(img_feat.astype(jnp.bfloat16),
                    ((0, b_pad - B), (0, n_pad - N), (0, f_pad - F)))
    ques_p = jnp.pad(ques_feat.astype(jnp.bfloat16),
                     ((0, b_pad - B), (0, dq_pad - Dq)))

    # Empty-region mask, computed once from the raw image features.  fc12 has no
    # bias, so a zero feature row <=> a zero image embedding row (what PyTorch
    # masks on).  Padded regions / batch rows are always masked; the finite
    # -1e30 (instead of -inf) keeps an all-masked row NaN-free.
    if v_mask:
        valid = jnp.sum(jnp.abs(img_feat), axis=2) != 0.0        # (B, N)
    else:
        valid = jnp.ones((B, N), dtype=bool)
    valid = jnp.pad(valid, ((0, b_pad - B), (0, n_pad - N)))     # pads with False
    mask_bias = jnp.where(valid, 0.0, -1e30).astype(jnp.float32)

    inputs = [mask_bias, ques_p, img_p, kp["wq0"], kp["bq0"], kp["wi0"], kp["wh0"]]
    in_specs = [
        pl.BlockSpec((bt, n_pad), lambda b: (b, 0)),             # mask bias
        pl.BlockSpec((bt, dq_pad), lambda b: (b, 0)),            # ques_feat
        pl.BlockSpec((bt, n_pad, f_pad), lambda b: (b, 0, 0)),   # img_feat
        pl.BlockSpec((dq_pad, a_pad), lambda b: (0, 0)),         # Wq0 (VMEM-resident)
        pl.BlockSpec((1, a_pad), lambda b: (0, 0)),              # bq0
        pl.BlockSpec((f_pad, a_pad), lambda b: (0, 0)),          # Wi0
        pl.BlockSpec((1, a_pad), lambda b: (0, 0)),              # Wh0 (fc13 weight)
    ]
    if num_stacks > 1:
        s1 = num_stacks - 1
        inputs += [kp["wqs"], kp["bqs"], kp["wis"], kp["whs"]]
        in_specs += [
            pl.BlockSpec((s1, a_pad, a_pad), lambda b: (0, 0, 0)),
            pl.BlockSpec((s1, 1, a_pad), lambda b: (0, 0, 0)),
            pl.BlockSpec((s1, f_pad, a_pad), lambda b: (0, 0, 0)),
            pl.BlockSpec((s1, 1, a_pad), lambda b: (0, 0, 0)),
        ]
    inputs.append(kp["bhs"])                                     # fc13 biases -> SMEM
    in_specs.append(pl.BlockSpec(memory_space=pltpu.MemorySpace.SMEM))

    # Advisory cost model for XLA's scheduler.
    flops = 0
    for s in range(num_stacks):
        din = dq_pad if s == 0 else a_pad
        flops += (2 * b_pad * din * a_pad + 2 * b_pad * n_pad * f_pad * a_pad
                  + 8 * b_pad * n_pad * a_pad)
    transcendentals = num_stacks * (b_pad * n_pad * a_pad + b_pad * n_pad)
    bytes_accessed = (4 * b_pad * n_pad + 2 * b_pad * dq_pad
                      + 2 * b_pad * n_pad * f_pad + 4 * b_pad * a_pad + wbytes // 2)

    out = pl.pallas_call(
        functools.partial(_san_fused_kernel, num_stacks=num_stacks),
        out_shape=jax.ShapeDtypeStruct((b_pad, a_pad), jnp.float32),
        grid_spec=pltpu.PrefetchScalarGridSpec(
            num_scalar_prefetch=0,
            grid=grid,
            in_specs=in_specs,
            out_specs=pl.BlockSpec((bt, a_pad), lambda b: (b, 0)),
        ),
        compiler_params=pltpu.CompilerParams(
            dimension_semantics=("parallel",),
            vmem_limit_bytes=vmem_limit),
        cost_estimate=pl.CostEstimate(flops=int(flops),
                                      transcendentals=int(transcendentals),
                                      bytes_accessed=int(bytes_accessed)),
    )(*inputs)

    return out[:B, :A]


class StackedAttention:
    """JAX/Pallas port of the PyTorch StackedAttention module (inference semantics)."""

    def __init__(self, num_stacks, img_feat_size, ques_feat_size, att_size,
                 output_size, drop_ratio, key=None):
        self.num_stacks = num_stacks
        self.img_feat_size = img_feat_size
        self.ques_feat_size = ques_feat_size
        self.att_size = att_size
        self.output_size = output_size   # unused by forward (matches the PyTorch module)
        self.drop_ratio = drop_ratio     # nn.Dropout is identity at inference

        if key is None:
            key = jax.random.PRNGKey(0)

        def linear(k, fan_in, shape):
            bound = 1.0 / float(fan_in) ** 0.5
            return jax.random.uniform(k, shape, jnp.float32, -bound, bound)

        n_keys = 5 + 5 * max(num_stacks - 1, 0)
        keys = jax.random.split(key, n_keys)
        it = iter(range(n_keys))

        # fc11: ques_feat_size -> att_size (bias); stored (in, out) for x @ W.
        self.wq0 = linear(keys[next(it)], ques_feat_size, (ques_feat_size, att_size))
        self.bq0 = linear(keys[next(it)], ques_feat_size, (1, att_size))
        # fc12: img_feat_size -> att_size (no bias).
        self.wi0 = linear(keys[next(it)], img_feat_size, (img_feat_size, att_size))
        # fc13: att_size -> 1 (bias); kept in PyTorch (out, in) = (1, att_size) layout.
        self.wh0 = linear(keys[next(it)], att_size, (1, att_size))
        self.bh0 = linear(keys[next(it)], att_size, (1, 1))

        self.layers = []
        for _ in range(num_stacks - 1):
            wq = linear(keys[next(it)], att_size, (att_size, att_size))
            bq = linear(keys[next(it)], att_size, (1, att_size))
            wi = linear(keys[next(it)], img_feat_size, (img_feat_size, att_size))
            wh = linear(keys[next(it)], att_size, (1, att_size))
            bh = linear(keys[next(it)], att_size, (1, 1))
            self.layers.append((wq, bq, wi, wh, bh))

        self._build_kernel_params()

    def _build_kernel_params(self):
        """Zero-pad weights to lane-dense shapes and cast matmul weights to bf16."""
        a_pad = _round_up(self.att_size, 128)
        f_pad = _round_up(self.img_feat_size, 128)
        dq_pad = _round_up(self.ques_feat_size, 128)

        def pad2(w, rows, cols):
            return jnp.pad(w, ((0, rows - w.shape[0]), (0, cols - w.shape[1])))

        kp = {
            "num_stacks": self.num_stacks,
            "att_size": self.att_size,
            "wq0": pad2(self.wq0, dq_pad, a_pad).astype(jnp.bfloat16),
            "bq0": pad2(self.bq0, 1, a_pad).astype(jnp.float32),
            "wi0": pad2(self.wi0, f_pad, a_pad).astype(jnp.bfloat16),
            "wh0": pad2(self.wh0, 1, a_pad).astype(jnp.float32),
            "bhs": jnp.stack([self.bh0[0, 0]]
                             + [l[4][0, 0] for l in self.layers]).astype(jnp.float32),
        }
        if self.num_stacks > 1:
            kp["wqs"] = jnp.stack([pad2(l[0], a_pad, a_pad) for l in self.layers]
                                  ).astype(jnp.bfloat16)
            kp["bqs"] = jnp.stack([pad2(l[1], 1, a_pad) for l in self.layers]
                                  ).astype(jnp.float32)
            kp["wis"] = jnp.stack([pad2(l[2], f_pad, a_pad) for l in self.layers]
                                  ).astype(jnp.bfloat16)
            kp["whs"] = jnp.stack([pad2(l[3], 1, a_pad) for l in self.layers]
                                  ).astype(jnp.float32)
        self.kernel_params = kp

    def __call__(self, img_feat, ques_feat, v_mask=True):
        return stacked_attention_fused(img_feat, ques_feat, self.kernel_params,
                                       v_mask=v_mask)


def _ref_forward(module, img_feat, ques_feat, v_mask=True):
    """Plain-JAX reference mirroring the PyTorch module (f32, -inf mask, fc13 bias)."""
    hi = jax.lax.Precision.HIGHEST

    def step(u_in, wq, bq, wi, wh, bh, base_is_q):
        q = jnp.dot(u_in, wq, precision=hi) + bq
        im = jnp.einsum('bnf,fa->bna', img_feat, wi, precision=hi)
        h = jnp.tanh(q[:, None, :] + im)
        logits = jnp.sum(h * wh[None, :, :], axis=2) + bh
        if v_mask:
            logits = jnp.where(jnp.sum(jnp.abs(im), axis=2) == 0.0, -jnp.inf, logits)
        p = jax.nn.softmax(logits, axis=1)
        ws = jnp.sum(im * p[:, :, None], axis=1)
        return (q if base_is_q else u_in) + ws

    u = step(ques_feat, module.wq0, module.bq0, module.wi0, module.wh0,
             module.bh0, True)
    for (wq, bq, wi, wh, bh) in module.layers:
        u = step(u, wq, bq, wi, wh, bh, False)
    return u


if __name__ == "__main__":
    key = jax.random.PRNGKey(0)
    k_param, k_img, k_ques = jax.random.split(key, 3)

    B, N = 2, 16                       # batch, image regions
    img_feat_size, ques_feat_size, att_size = 32, 32, 32
    num_stacks = 2

    module = StackedAttention(num_stacks, img_feat_size, ques_feat_size,
                              att_size, output_size=32, drop_ratio=0.0,
                              key=k_param)

    img_feat = jax.random.normal(k_img, (B, N, img_feat_size), jnp.float32)
    img_feat = img_feat.at[0, 3, :].set(0.0)   # exercise the v_mask path
    ques_feat = jax.random.normal(k_ques, (B, ques_feat_size), jnp.float32)

    out = module(img_feat, ques_feat, v_mask=True)
    out = jax.block_until_ready(out)
    assert out.shape == (B, att_size), out.shape
    assert bool(jnp.all(jnp.isfinite(out))), "non-finite values in kernel output"

    ref = _ref_forward(module, img_feat, ques_feat, v_mask=True)
    max_err = float(jnp.max(jnp.abs(out - ref)))
    # Tolerance accommodates the bf16 matmul inputs (f32 accumulation) vs the
    # HIGHEST-precision f32 reference.
    assert jnp.allclose(out, ref, atol=2e-2, rtol=2e-2), (
        "StackedAttention Pallas kernel mismatch vs reference; "
        f"max|diff|={max_err}")

    print("KERNEL_OK")
</pallas_src>

<mosaic_0001>
module attributes {stable_mosaic.version = 11 : i64} {
  func.func @_san_fused_kernel(%arg0: i32, %arg1: memref<8x16xf32, #tpu.memory_space<vmem>>, %arg2: memref<8x128xbf16, #tpu.memory_space<vmem>>, %arg3: memref<8x16x128xbf16, #tpu.memory_space<vmem>>, %arg4: memref<128x128xbf16, #tpu.memory_space<vmem>>, %arg5: memref<1x128xf32, #tpu.memory_space<vmem>>, %arg6: memref<128x128xbf16, #tpu.memory_space<vmem>>, %arg7: memref<1x128xf32, #tpu.memory_space<vmem>>, %arg8: memref<1x128x128xbf16, #tpu.memory_space<vmem>>, %arg9: memref<1x1x128xf32, #tpu.memory_space<vmem>>, %arg10: memref<1x128x128xbf16, #tpu.memory_space<vmem>>, %arg11: memref<1x1x128xf32, #tpu.memory_space<vmem>>, %arg12: memref<2xf32, #tpu.memory_space<smem>>, %arg13: memref<8x128xf32, #tpu.memory_space<vmem>>) attributes {dimension_semantics = [#tpu.dimension_semantics<parallel>], iteration_bounds = array<i64: 1>, scalar_prefetch = 0 : i64, scratch_operands = 0 : i64, tpu.core_type = #tpu.core_type<tc>, window_params = [{transform_indices = @transform_0, window_bounds = array<i64: 8, 16>}, {transform_indices = @transform_1, window_bounds = array<i64: 8, 128>}, {transform_indices = @transform_2, window_bounds = array<i64: 8, 16, 128>}, {pipeline_mode = #tpu.pipeline_mode<synchronous>, transform_indices = @transform_3, window_bounds = array<i64: 128, 128>}, {pipeline_mode = #tpu.pipeline_mode<synchronous>, transform_indices = @transform_4, window_bounds = array<i64: 1, 128>}, {pipeline_mode = #tpu.pipeline_mode<synchronous>, transform_indices = @transform_5, window_bounds = array<i64: 128, 128>}, {pipeline_mode = #tpu.pipeline_mode<synchronous>, transform_indices = @transform_6, window_bounds = array<i64: 1, 128>}, {pipeline_mode = #tpu.pipeline_mode<synchronous>, transform_indices = @transform_7, window_bounds = array<i64: 1, 128, 128>}, {pipeline_mode = #tpu.pipeline_mode<synchronous>, transform_indices = @transform_8, window_bounds = array<i64: 1, 1, 128>}, {pipeline_mode = #tpu.pipeline_mode<synchronous>, transform_indices = @transform_9, window_bounds = array<i64: 1, 128, 128>}, {pipeline_mode = #tpu.pipeline_mode<synchronous>, transform_indices = @transform_10, window_bounds = array<i64: 1, 1, 128>}, {transform_indices = @transform_11, window_bounds = array<i64: 2>}, {transform_indices = @transform_12, window_bounds = array<i64: 8, 128>}]} {
    %c0 = arith.constant 0 : index
    %c0_0 = arith.constant 0 : index
    %c0_1 = arith.constant 0 : index
    %0 = vector.load %arg3[%c0, %c0_0, %c0_1] : memref<8x16x128xbf16, #tpu.memory_space<vmem>>, vector<8x16x128xbf16>
    %c0_2 = arith.constant 0 : index
    %c0_3 = arith.constant 0 : index
    %1 = vector.load %arg1[%c0_2, %c0_3] : memref<8x16xf32, #tpu.memory_space<vmem>>, vector<8x16xf32>
    %2 = vector.shape_cast %0 : vector<8x16x128xbf16> to vector<128x128xbf16>
    %c0_4 = arith.constant 0 : index
    %c0_5 = arith.constant 0 : index
    %3 = vector.load %arg2[%c0_4, %c0_5] : memref<8x128xbf16, #tpu.memory_space<vmem>>, vector<8x128xbf16>
    %c0_6 = arith.constant 0 : index
    %c0_7 = arith.constant 0 : index
    %4 = vector.load %arg4[%c0_6, %c0_7] : memref<128x128xbf16, #tpu.memory_space<vmem>>, vector<128x128xbf16>
    %c0_8 = arith.constant 0 : index
    %c0_9 = arith.constant 0 : index
    %5 = vector.load %arg5[%c0_8, %c0_9] : memref<1x128xf32, #tpu.memory_space<vmem>>, vector<1x128xf32>
    %c0_10 = arith.constant 0 : index
    %c0_11 = arith.constant 0 : index
    %6 = vector.load %arg6[%c0_10, %c0_11] : memref<128x128xbf16, #tpu.memory_space<vmem>>, vector<128x128xbf16>
    %c0_12 = arith.constant 0 : index
    %c0_13 = arith.constant 0 : index
    %7 = vector.load %arg7[%c0_12, %c0_13] : memref<1x128xf32, #tpu.memory_space<vmem>>, vector<1x128xf32>
    %c0_14 = arith.constant 0 : index
    %8 = memref.load %arg12[%c0_14] : memref<2xf32, #tpu.memory_space<smem>>
    %cst = arith.constant dense<0.000000e+00> : vector<8x128xf32>
    %9 = tpu.matmul %3, %4, %cst {dimension_numbers = #tpu.dot_dimension_numbers<[1], [0], [0], [1], [0, 0, 1, 1], [], []>} : vector<8x128xbf16>, vector<128x128xbf16>, vector<8x128xf32> -> vector<8x128xf32>
    %10 = vector.broadcast %5 : vector<1x128xf32> to vector<8x128xf32>
    %11 = arith.addf %9, %10 : vector<8x128xf32>
    %cst_15 = arith.constant dense<0.000000e+00> : vector<128x128xf32>
    %12 = tpu.matmul %2, %6, %cst_15 {dimension_numbers = #tpu.dot_dimension_numbers<[1], [0], [0], [1], [0, 0, 1, 1], [], []>} : vector<128x128xbf16>, vector<128x128xbf16>, vector<128x128xf32> -> vector<128x128xf32>
    %13 = vector.shape_cast %12 : vector<128x128xf32> to vector<8x16x128xf32>
    %14 = vector.shape_cast %11 : vector<8x128xf32> to vector<8x1x128xf32>
    %15 = vector.broadcast %14 : vector<8x1x128xf32> to vector<8x16x128xf32>
    %16 = arith.addf %15, %13 : vector<8x16x128xf32>
    %17 = math.tanh %16 : vector<8x16x128xf32>
    %18 = vector.shape_cast %7 : vector<1x128xf32> to vector<1x1x128xf32>
    %19 = vector.broadcast %18 : vector<1x1x128xf32> to vector<8x16x128xf32>
    %20 = arith.mulf %17, %19 : vector<8x16x128xf32>
    %cst_16 = arith.constant dense<0.000000e+00> : vector<8x16xf32>
    %21 = vector.multi_reduction <add>, %20, %cst_16 [2] : vector<8x16x128xf32> to vector<8x16xf32>
    %22 = vector.broadcast %8 : f32 to vector<8x16xf32>
    %23 = arith.addf %21, %22 : vector<8x16xf32>
    %24 = arith.addf %23, %1 : vector<8x16xf32>
    %cst_17 = arith.constant dense<0xFF800000> : vector<8xf32>
    %25 = vector.multi_reduction <maximumf>, %24, %cst_17 [1] : vector<8x16xf32> to vector<8xf32>
    %26 = vector.shape_cast %25 : vector<8xf32> to vector<8x1xf32>
    %27 = vector.broadcast %26 : vector<8x1xf32> to vector<8x16xf32>
    %28 = arith.subf %24, %27 : vector<8x16xf32>
    %29 = math.exp %28 : vector<8x16xf32>
    %cst_18 = arith.constant dense<0.000000e+00> : vector<8xf32>
    %30 = vector.multi_reduction <add>, %29, %cst_18 [1] : vector<8x16xf32> to vector<8xf32>
    %31 = vector.shape_cast %30 : vector<8xf32> to vector<8x1xf32>
    %32 = tpu.reciprocal %31 {approx = true} : vector<8x1xf32> -> vector<8x1xf32>
    %33 = vector.broadcast %32 : vector<8x1xf32> to vector<8x16xf32>
    %34 = arith.mulf %29, %33 : vector<8x16xf32>
    %35 = vector.shape_cast %34 : vector<8x16xf32> to vector<8x16x1xf32>
    %36 = vector.broadcast %35 : vector<8x16x1xf32> to vector<8x16x128xf32>
    %37 = arith.mulf %13, %36 : vector<8x16x128xf32>
    %cst_19 = arith.constant dense<0.000000e+00> : vector<8x128xf32>
    %38 = vector.multi_reduction <add>, %37, %cst_19 [1] : vector<8x16x128xf32> to vector<8x128xf32>
    %39 = arith.addf %11, %38 : vector<8x128xf32>
    %c0_20 = arith.constant 0 : index
    %c0_21 = arith.constant 0 : index
    %c0_22 = arith.constant 0 : index
    %40 = vector.load %arg8[%c0_20, %c0_21, %c0_22] : memref<1x128x128xbf16, #tpu.memory_space<vmem>>, vector<1x128x128xbf16>
    %41 = vector.shape_cast %40 : vector<1x128x128xbf16> to vector<128x128xbf16>
    %c0_23 = arith.constant 0 : index
    %c0_24 = arith.constant 0 : index
    %c0_25 = arith.constant 0 : index
    %42 = vector.load %arg9[%c0_23, %c0_24, %c0_25] : memref<1x1x128xf32, #tpu.memory_space<vmem>>, vector<1x1x128xf32>
    %43 = vector.shape_cast %42 : vector<1x1x128xf32> to vector<1x128xf32>
    %c0_26 = arith.constant 0 : index
    %c0_27 = arith.constant 0 : index
    %c0_28 = arith.constant 0 : index
    %44 = vector.load %arg10[%c0_26, %c0_27, %c0_28] : memref<1x128x128xbf16, #tpu.memory_space<vmem>>, vector<1x128x128xbf16>
    %45 = vector.shape_cast %44 : vector<1x128x128xbf16> to vector<128x128xbf16>
    %c0_29 = arith.constant 0 : index
    %c0_30 = arith.constant 0 : index
    %c0_31 = arith.constant 0 : index
    %46 = vector.load %arg11[%c0_29, %c0_30, %c0_31] : memref<1x1x128xf32, #tpu.memory_space<vmem>>, vector<1x1x128xf32>
    %47 = vector.shape_cast %46 : vector<1x1x128xf32> to vector<1x128xf32>
    %c1 = arith.constant 1 : index
    %48 = memref.load %arg12[%c1] : memref<2xf32, #tpu.memory_space<smem>>
    %49 = arith.truncf %39 : vector<8x128xf32> to vector<8x128xbf16>
    %cst_32 = arith.constant dense<0.000000e+00> : vector<8x128xf32>
    %50 = tpu.matmul %49, %41, %cst_32 {dimension_numbers = #tpu.dot_dimension_numbers<[1], [0], [0], [1], [0, 0, 1, 1], [], []>} : vector<8x128xbf16>, vector<128x128xbf16>, vector<8x128xf32> -> vector<8x128xf32>
    %51 = vector.broadcast %43 : vector<1x128xf32> to vector<8x128xf32>
    %52 = arith.addf %50, %51 : vector<8x128xf32>
    %cst_33 = arith.constant dense<0.000000e+00> : vector<128x128xf32>
    %53 = tpu.matmul %2, %45, %cst_33 {dimension_numbers = #tpu.dot_dimension_numbers<[1], [0], [0], [1], [0, 0, 1, 1], [], []>} : vector<128x128xbf16>, vector<128x128xbf16>, vector<128x128xf32> -> vector<128x128xf32>
    %54 = vector.shape_cast %53 : vector<128x128xf32> to vector<8x16x128xf32>
    %55 = vector.shape_cast %52 : vector<8x128xf32> to vector<8x1x128xf32>
    %56 = vector.broadcast %55 : vector<8x1x128xf32> to vector<8x16x128xf32>
    %57 = arith.addf %56, %54 : vector<8x16x128xf32>
    %58 = math.tanh %57 : vector<8x16x128xf32>
    %59 = vector.shape_cast %47 : vector<1x128xf32> to vector<1x1x128xf32>
    %60 = vector.broadcast %59 : vector<1x1x128xf32> to vector<8x16x128xf32>
    %61 = arith.mulf %58, %60 : vector<8x16x128xf32>
    %cst_34 = arith.constant dense<0.000000e+00> : vector<8x16xf32>
    %62 = vector.multi_reduction <add>, %61, %cst_34 [2] : vector<8x16x128xf32> to vector<8x16xf32>
    %63 = vector.broadcast %48 : f32 to vector<8x16xf32>
    %64 = arith.addf %62, %63 : vector<8x16xf32>
    %65 = arith.addf %64, %1 : vector<8x16xf32>
    %cst_35 = arith.constant dense<0xFF800000> : vector<8xf32>
    %66 = vector.multi_reduction <maximumf>, %65, %cst_35 [1] : vector<8x16xf32> to vector<8xf32>
    %67 = vector.shape_cast %66 : vector<8xf32> to vector<8x1xf32>
    %68 = vector.broadcast %67 : vector<8x1xf32> to vector<8x16xf32>
    %69 = arith.subf %65, %68 : vector<8x16xf32>
    %70 = math.exp %69 : vector<8x16xf32>
    %cst_36 = arith.constant dense<0.000000e+00> : vector<8xf32>
    %71 = vector.multi_reduction <add>, %70, %cst_36 [1] : vector<8x16xf32> to vector<8xf32>
    %72 = vector.shape_cast %71 : vector<8xf32> to vector<8x1xf32>
    %73 = tpu.reciprocal %72 {approx = true} : vector<8x1xf32> -> vector<8x1xf32>
    %74 = vector.broadcast %73 : vector<8x1xf32> to vector<8x16xf32>
    %75 = arith.mulf %70, %74 : vector<8x16xf32>
    %76 = vector.shape_cast %75 : vector<8x16xf32> to vector<8x16x1xf32>
    %77 = vector.broadcast %76 : vector<8x16x1xf32> to vector<8x16x128xf32>
    %78 = arith.mulf %54, %77 : vector<8x16x128xf32>
    %cst_37 = arith.constant dense<0.000000e+00> : vector<8x128xf32>
    %79 = vector.multi_reduction <add>, %78, %cst_37 [1] : vector<8x16x128xf32> to vector<8x128xf32>
    %80 = arith.addf %39, %79 : vector<8x128xf32>
    %c0_38 = arith.constant 0 : index
    %c0_39 = arith.constant 0 : index
    %81 = vector.load %arg13[%c0_38, %c0_39] : memref<8x128xf32, #tpu.memory_space<vmem>>, vector<8x128xf32>
    tpu.vector_store %arg13[%c0_38, %c0_39], %80 {strides = array<i32>} : memref<8x128xf32, #tpu.memory_space<vmem>>, vector<8x128xf32>,
    return
  }
  func.func @transform_0(%arg0: i32) -> (i32, i32) {
    %c0_i32 = arith.constant 0 : i32
    %c0_i32_0 = arith.constant 0 : i32
    return %arg0, %c0_i32 : i32, i32
  }
  func.func @transform_1(%arg0: i32) -> (i32, i32) {
    %c0_i32 = arith.constant 0 : i32
    %c0_i32_0 = arith.constant 0 : i32
    return %arg0, %c0_i32 : i32, i32
  }
  func.func @transform_2(%arg0: i32) -> (i32, i32, i32) {
    %c0_i32 = arith.constant 0 : i32
    %c0_i32_0 = arith.constant 0 : i32
    %c0_i32_1 = arith.constant 0 : i32
    return %arg0, %c0_i32, %c0_i32_0 : i32, i32, i32
  }
  func.func @transform_3(%arg0: i32) -> (i32, i32) {
    %c0_i32 = arith.constant 0 : i32
    %c0_i32_0 = arith.constant 0 : i32
    %c0_i32_1 = arith.constant 0 : i32
    return %c0_i32, %c0_i32_0 : i32, i32
  }
  func.func @transform_4(%arg0: i32) -> (i32, i32) {
    %c0_i32 = arith.constant 0 : i32
    %c0_i32_0 = arith.constant 0 : i32
    %c0_i32_1 = arith.constant 0 : i32
    return %c0_i32, %c0_i32_0 : i32, i32
  }
  func.func @transform_5(%arg0: i32) -> (i32, i32) {
    %c0_i32 = arith.constant 0 : i32
    %c0_i32_0 = arith.constant 0 : i32
    %c0_i32_1 = arith.constant 0 : i32
    return %c0_i32, %c0_i32_0 : i32, i32
  }
  func.func @transform_6(%arg0: i32) -> (i32, i32) {
    %c0_i32 = arith.constant 0 : i32
    %c0_i32_0 = arith.constant 0 : i32
    %c0_i32_1 = arith.constant 0 : i32
    return %c0_i32, %c0_i32_0 : i32, i32
  }
  func.func @transform_7(%arg0: i32) -> (i32, i32, i32) {
    %c0_i32 = arith.constant 0 : i32
    %c0_i32_0 = arith.constant 0 : i32
    %c0_i32_1 = arith.constant 0 : i32
    %c0_i32_2 = arith.constant 0 : i32
    return %c0_i32, %c0_i32_0, %c0_i32_1 : i32, i32, i32
  }
  func.func @transform_8(%arg0: i32) -> (i32, i32, i32) {
    %c0_i32 = arith.constant 0 : i32
    %c0_i32_0 = arith.constant 0 : i32
    %c0_i32_1 = arith.constant 0 : i32
    %c0_i32_2 = arith.constant 0 : i32
    return %c0_i32, %c0_i32_0, %c0_i32_1 : i32, i32, i32
  }
  func.func @transform_9(%arg0: i32) -> (i32, i32, i32) {
    %c0_i32 = arith.constant 0 : i32
    %c0_i32_0 = arith.constant 0 : i32
    %c0_i32_1 = arith.constant 0 : i32
    %c0_i32_2 = arith.constant 0 : i32
    return %c0_i32, %c0_i32_0, %c0_i32_1 : i32, i32, i32
  }
  func.func @transform_10(%arg0: i32) -> (i32, i32, i32) {
    %c0_i32 = arith.constant 0 : i32
    %c0_i32_0 = arith.constant 0 : i32
    %c0_i32_1 = arith.constant 0 : i32
    %c0_i32_2 = arith.constant 0 : i32
    return %c0_i32, %c0_i32_0, %c0_i32_1 : i32, i32, i32
  }
  func.func @transform_11(%arg0: i32) -> i32 {
    %c0_i32 = arith.constant 0 : i32
    %c0_i32_0 = arith.constant 0 : i32
    return %c0_i32 : i32
  }
  func.func @transform_12(%arg0: i32) -> (i32, i32) {
    %c0_i32 = arith.constant 0 : i32
    %c0_i32_0 = arith.constant 0 : i32
    return %arg0, %c0_i32 : i32, i32
  }
}

</mosaic_0001>

<bundles_post_ra>
// kernel: tpu_custom_call.1
= control target key start
LH: loop header
LB: loop body
LE: loop exit
PB: predicated region body
PF: predicated region fallthrough
CT: control target
= control target key end

     0   :  { %17 = vsyncpa [#allocation3], 0  ;;  %s4104_s0 = inlined_call_operand.hbm [shape: f32[8,16], index: 0, kind: input, shape index: {}]   ;;  %s4105_s1 = inlined_call_operand.hbm [shape: bf16[8,128], index: 1, kind: input, shape index: {}]   ;;  %s4106_s2 = inlined_call_operand.hbm [shape: bf16[8,16,128], index: 2, kind: input, shape index: {}]   ;;  %s4107_s3 = inlined_call_operand.hbm [shape: bf16[128,128], index: 3, kind: input, shape index: {}]   ;;  %s4108_s4 = inlined_call_operand.vmem [shape: f32[1,128], index: 4, kind: input, shape index: {}]   ;;  %s4109_s5 = inlined_call_operand.hbm [shape: bf16[128,128], index: 5, kind: input, shape index: {}]   ;;  %s4110_s6 = inlined_call_operand.vmem [shape: f32[1,128], index: 6, kind: input, shape index: {}]   ;;  %s4111_s7 = inlined_call_operand.hbm [shape: bf16[1,128,128], index: 7, kind: input, shape index: {}]   ;;  %s4112_s8 = inlined_call_operand.vmem [shape: f32[1,1,128], index: 8, kind: input, shape index: {}]   ;;  %s4113_s9 = inlined_call_operand.hbm [shape: bf16[1,128,128], index: 9, kind: input, shape index: {}]   ;;  %s4114_s10 = inlined_call_operand.vmem [shape: f32[1,1,128], index: 10, kind: input, shape index: {}]   ;;  %s4115_s11 = inlined_call_operand.vmem [shape: f32[2], index: 11, kind: input, shape index: {}]   ;;  %s4116_s12 = inlined_call_operand.hbm [shape: f32[8,128], index: 12, kind: output, shape index: {}]  }
   0x1   :  { %18 = vsyncpa [#allocation7], 0 }
   0x2   :  { %19 = vsyncpa [#allocation10], 0 }
   0x3   :  { %20 = vsyncpa [#allocation13], 0 }
   0x4   :  { %21 = vsyncpa [#allocation5], 0 }
   0x5   :  { %22 = vsyncpa [#allocation4], 0  ;;  %s3132_s21 = smov [#allocation6]   ;;  %s2932_s25 = scalar_lea.hbm %s4105_s1, 64 }
   0x6   :  { %s39_s22 = sshll.u32 %s3132_s21, 4  ;;  %p2933_p0 = scmp.ne.s32.totalorder %s4105_s1, %s2932_s25  ;;  %s40_s22 = int_to_ptr.vmem [resolvable:$true] %s39_s22 }
   0x7   :  { %p2936_p1 = scmp.lt.u32.totalorder %s2932_s25, %s4105_s1 }
   0x9   :  { %p2938_p2 = pnand %p2936_p1, %p2933_p0 }
   0xb   :  { %2941 = shalt.err (!%p2938_p2)
}
   0xc   :  { %s2942_s30 = scalar_lea.vmem %s40_s22, 64  ;;  %p2947_p4 = scmp.lt.s32.totalorder %s40_s22, %s40_s22 }
   0xd   :  { %p2943_p3 = scmp.ne.s32.totalorder %s40_s22, %s2942_s30  ;;  %p2948_p5 = scmp.lt.s32.totalorder %s2942_s30, %s2942_s30 }
   0xf   :  { %p2949_p6 = por %p2948_p5, %p2947_p4 }
  0x11   :  { %p2950_p7 = pnand %p2949_p6, %p2943_p3 }
  0x13   :  { %2953 = shalt.err (!%p2950_p7)
}
  0x14   :  { %42 = dma.hbm_to_vmem [thread:$0]  %s4105_s1, 64, %s40_s22, [#allocation7]  }
  0x15   :  { %s3133_s15 = smov [#allocation9]   ;;  %s3134_s17 = smov [#allocation12]  }
  0x16   :  { %s60_s16 = sshll.u32 %s3133_s15, 4  ;;  %s88_s18 = sshll.u32 %s3134_s17, 4  ;;  %s61_s16 = int_to_ptr.vmem [resolvable:$true] %s60_s16  ;;  %s89_s18 = int_to_ptr.vmem [resolvable:$true] %s88_s18 }
  0x17   :  { %s2954_s21 = scalar_lea.hbm %s4107_s3, 1024 }
  0x18   :  { %p2955_p8 = scmp.ne.s32.totalorder %s4107_s3, %s2954_s21  ;;  %p2958_p9 = scmp.lt.u32.totalorder %s2954_s21, %s4107_s3 }
  0x1a   :  { %p2960_p10 = pnand %p2958_p9, %p2955_p8 }
  0x1c   :  { %2963 = shalt.err (!%p2960_p10)
}
  0x1d   :  { %s2964_s1 = scalar_lea.vmem %s61_s16, 1024  ;;  %p2969_p12 = scmp.lt.s32.totalorder %s61_s16, %s61_s16 }
  0x1e   :  { %p2965_p11 = scmp.ne.s32.totalorder %s61_s16, %s2964_s1  ;;  %p2970_p13 = scmp.lt.s32.totalorder %s2964_s1, %s2964_s1 }
  0x20   :  { %p2971_p0 = por %p2970_p13, %p2969_p12 }
  0x22   :  { %p2972_p1 = pnand %p2971_p0, %p2965_p11 }
  0x24   :  { %2975 = shalt.err (!%p2972_p1)
}
  0x25   :  { %s3135_s22 = smov 64   ;;  %s3136_s27 = smov 4  }
  0x26   :  { %66 = dma.hbm_to_vmem [thread:$0]  %s4107_s3, 1024, %s61_s16, [#allocation10], %s3135_s22, %s3135_s22, %s3136_s27  }
  0x27   :  { %s2976_s14 = scalar_lea.hbm %s4111_s7, 1024 }
  0x28   :  { %p2977_p2 = scmp.ne.s32.totalorder %s4111_s7, %s2976_s14  ;;  %p2980_p3 = scmp.lt.u32.totalorder %s2976_s14, %s4111_s7 }
  0x2a   :  { %p2982_p4 = pnand %p2980_p3, %p2977_p2 }
  0x2c   :  { %2985 = shalt.err (!%p2982_p4)
}
  0x2d   :  { %s2986_s21 = scalar_lea.vmem %s89_s18, 1024  ;;  %p2991_p6 = scmp.lt.s32.totalorder %s89_s18, %s89_s18 }
  0x2e   :  { %p2987_p5 = scmp.ne.s32.totalorder %s89_s18, %s2986_s21  ;;  %p2992_p7 = scmp.lt.s32.totalorder %s2986_s21, %s2986_s21 }
  0x30   :  { %p2993_p8 = por %p2992_p7, %p2991_p6 }
  0x32   :  { %p2994_p9 = pnand %p2993_p8, %p2987_p5 }
  0x34   :  { %2997 = shalt.err (!%p2994_p9)
}
  0x35   :  { %94 = dma.hbm_to_vmem [thread:$0]  %s4111_s7, 1024, %s89_s18, [#allocation13], %s3135_s22, %s3135_s22, %s3136_s27  }
  0x36   :  { %s3137_s23 = smov [#allocation2]   ;;  %s3138_s25 = smov [#allocation8]  }
  0x37   :  { %s29_s24 = sshll.u32 %s3137_s23, 4  ;;  %s48_s26 = sshll.u32 %s3138_s25, 4  ;;  %s30_s24 = int_to_ptr.vmem [resolvable:$true] %s29_s24  ;;  %s49_s26 = int_to_ptr.vmem [resolvable:$true] %s48_s26 }
  0x38   :  { %s2998_s29 = scalar_lea.hbm %s4104_s0, 128 }
  0x39   :  { %p2999_p10 = scmp.ne.s32.totalorder %s4104_s0, %s2998_s29  ;;  %p3002_p11 = scmp.lt.u32.totalorder %s2998_s29, %s4104_s0 }
  0x3b   :  { %p3004_p12 = pnand %p3002_p11, %p2999_p10 }
  0x3d   :  { %3007 = shalt.err (!%p3004_p12)
}
  0x3e   :  { %s3008_s7 = scalar_lea.vmem %s30_s24, 128  ;;  %p3013_p0 = scmp.lt.s32.totalorder %s30_s24, %s30_s24 }
  0x3f   :  { %p3009_p13 = scmp.ne.s32.totalorder %s30_s24, %s3008_s7  ;;  %p3014_p1 = scmp.lt.s32.totalorder %s3008_s7, %s3008_s7 }
  0x41   :  { %p3015_p2 = por %p3014_p1, %p3013_p0 }
  0x43   :  { %p3016_p3 = pnand %p3015_p2, %p3009_p13 }
  0x45   :  { %3019 = shalt.err (!%p3016_p3)
}
  0x46   :  { %32 = dma.hbm_to_vmem [thread:$0]  %s4104_s0, 128, %s30_s24, [#allocation3]  }
  0x47   :  { %s3020_s21 = scalar_lea.hbm %s4106_s2, 1024 }
  0x48   :  { %p3021_p4 = scmp.ne.s32.totalorder %s4106_s2, %s3020_s21  ;;  %p3024_p5 = scmp.lt.u32.totalorder %s3020_s21, %s4106_s2 }
  0x4a   :  { %p3026_p6 = pnand %p3024_p5, %p3021_p4 }
  0x4c   :  { %3029 = shalt.err (!%p3026_p6)
}
  0x4d   :  { %s3030_s1 = scalar_lea.vmem %s49_s26, 1024  ;;  %p3035_p8 = scmp.lt.s32.totalorder %s49_s26, %s49_s26 }
  0x4e   :  { %p3031_p7 = scmp.ne.s32.totalorder %s49_s26, %s3030_s1  ;;  %p3036_p9 = scmp.lt.s32.totalorder %s3030_s1, %s3030_s1 }
  0x50   :  { %p3037_p10 = por %p3036_p9, %p3035_p8 }
  0x52   :  { %p3038_p11 = pnand %p3037_p10, %p3031_p7 }
  0x54   :  { %3041 = shalt.err (!%p3038_p11)
}
  0x55   :  { %54 = dma.hbm_to_vmem [thread:$0]  %s4106_s2, 1024, %s49_s26, [#allocation7], %s3135_s22, %s3135_s22, %s3136_s27  }
  0x56   :  { %s3139_s28 = smov [#allocation11]   ;;  %s3140_s30 = smov [#allocation14]  }
  0x57   :  { %s74_s29 = sshll.u32 %s3139_s28, 4  ;;  %s102_s13 = sshll.u32 %s3140_s30, 4  ;;  %s75_s29 = int_to_ptr.vmem [resolvable:$true] %s74_s29  ;;  %s103_s13 = int_to_ptr.vmem [resolvable:$true] %s102_s13 }
  0x58   :  { %s3042_s7 = scalar_lea.hbm %s4109_s5, 1024 }
  0x59   :  { %p3043_p12 = scmp.ne.s32.totalorder %s4109_s5, %s3042_s7  ;;  %p3046_p13 = scmp.lt.u32.totalorder %s3042_s7, %s4109_s5 }
  0x5b   :  { %p3048_p0 = pnand %p3046_p13, %p3043_p12 }
  0x5d   :  { %3051 = shalt.err (!%p3048_p0)
}
  0x5e   :  { %s3052_s2 = scalar_lea.vmem %s75_s29, 1024  ;;  %p3057_p2 = scmp.lt.s32.totalorder %s75_s29, %s75_s29 }
  0x5f   :  { %p3053_p1 = scmp.ne.s32.totalorder %s75_s29, %s3052_s2  ;;  %p3058_p3 = scmp.lt.s32.totalorder %s3052_s2, %s3052_s2 }
  0x61   :  { %p3059_p4 = por %p3058_p3, %p3057_p2 }
  0x63   :  { %p3060_p5 = pnand %p3059_p4, %p3053_p1 }
  0x65   :  { %3063 = shalt.err (!%p3060_p5)
}
  0x66   :  { %80 = dma.hbm_to_vmem [thread:$0]  %s4109_s5, 1024, %s75_s29, [#allocation10], %s3135_s22, %s3135_s22, %s3136_s27  }
  0x67   :  { %s117_s23 = sshll.u32 %s4115_s11, 4  ;;  %s3064_s0 = scalar_lea.hbm %s4113_s9, 1024  ;;  %s118_s23 = int_to_ptr.vmem [resolvable:$true] %s117_s23 }
  0x68   :  { %p3065_p6 = scmp.ne.s32.totalorder %s4113_s9, %s3064_s0  ;;  %p3068_p7 = scmp.lt.u32.totalorder %s3064_s0, %s4113_s9 }
  0x6a   :  { %p3070_p8 = pnand %p3068_p7, %p3065_p6 }
  0x6c   :  { %3073 = shalt.err (!%p3070_p8)
}
  0x6d   :  { %s3074_s5 = scalar_lea.vmem %s103_s13, 1024  ;;  %p3079_p10 = scmp.lt.s32.totalorder %s103_s13, %s103_s13 }
  0x6e   :  { %p3075_p9 = scmp.ne.s32.totalorder %s103_s13, %s3074_s5  ;;  %p3080_p11 = scmp.lt.s32.totalorder %s3074_s5, %s3074_s5 }
  0x70   :  { %p3081_p12 = por %p3080_p11, %p3079_p10 }
  0x72   :  { %p3082_p13 = pnand %p3081_p12, %p3075_p9 }
  0x74   :  { %3085 = shalt.err (!%p3082_p13)
}
  0x75   :  { %108 = dma.hbm_to_vmem [thread:$0]  %s4113_s9, 1024, %s103_s13, [#allocation13], %s3135_s22, %s3135_s22, %s3136_s27  }
  0x76   :  { %s3086_s15 = scalar_lea.vmem %s118_s23, 16  ;;  %p3091_p1 = scmp.lt.s32.totalorder %s118_s23, %s118_s23 }
  0x77   :  { %p3087_p0 = scmp.ne.s32.totalorder %s118_s23, %s3086_s15  ;;  %p3092_p2 = scmp.lt.s32.totalorder %s3086_s15, %s3086_s15 }
  0x79   :  { %p3093_p3 = por %p3092_p2, %p3091_p1 }
  0x7b   :  { %p3094_p4 = pnand %p3093_p3, %p3087_p0 }
  0x7d   :  { %3097 = shalt.err (!%p3094_p4)
}
  0x7e   :  { %s3141_s7 = smov [#allocation15]  }
  0x7f   :  { %120 = dma.vmem_to_smem %s118_s23, 16, %s3141_s7, [#allocation5]  }
  0x80   :  { %3120 = dma.done.wait [#allocation3], 128  }
  0x81   :  { %3121 = vsyncadd [#allocation3], 4294967168 }
  0x82   :  { %3122 = dma.done.wait [#allocation7], 1088  }
  0x83   :  { %3123 = vsyncadd [#allocation7], 4294966208 }
  0x84   :  { %3124 = dma.done.wait [#allocation10], 2048  }
  0x85   :  { %3125 = vsyncadd [#allocation10], 4294965248 }
  0x86   :  { %3126 = dma.done.wait [#allocation13], 2048  }
  0x87   :  { %3127 = vsyncadd [#allocation13], 4294965248 }
  0x88   :  { %3128 = dma.done.wait [#allocation5], 16  }
  0x89   :  { %3129 = vsyncadd [#allocation5], 4294967280 }
  0x8a   :  { %145 = sfence }
  0x8b   :  { %v2753_v0 = vld [vmem:[#allocation9] sm:$0xff]   ;;  %v4117_v1 = vmov 0.0   ;;  %v2755_v3 = vld [vmem:[#allocation9 + $0x8] sm:$0xff]   ;;  %vm3143_vm0 = vmmov 0   ;;  %v2758_v5 = vld [vmem:[#allocation11 + $0x10] sm:$0xff]   ;;  %v4119_v10 = vlaneseq  ;;  %vm876_vm1 = vcmask 130112  }
  0x8c   :  { %2632 = vmatprep.subr.bf16.mxu0 %v4117_v1  ;;  %v2754_v2 = vld [vmem:[#allocation11] sm:$0xff]   ;;  %2648 = vmatprep.mubr.msk.bf16.mxu0 %vm3143_vm0, %v4117_v1  ;;  %v2756_v4 = vld [vmem:[#allocation11 + $0x8] sm:$0xff]   ;;  %v2757_v6 = vld [vmem:[#allocation9 + $0x10] sm:$0xff]   ;;  %v3144_v43 = vmov 1966171168   ;;  %vm941_vm2 = vcmask 1041409  }
  0x8d   :  { %2633 = vmatpush3.bf16.msra.mxu0 %v2753_v0  ;;  %2652 = vmatprep.subr.bf16.mxu1 %v2754_v2  ;;  %v2760_v7 = vld [vmem:[#allocation11 + $0x18] sm:$0xff]   ;;  %v2762_v9 = vld [vmem:[#allocation11 + $0x20] sm:$0xff]   ;;  %v2764_v12 = vld [vmem:[#allocation11 + $0x28] sm:$0xff]   ;;  %v3324_v14 = vshrl.u32 %v4119_v10, 7  ;;  %v490_v44 = vunpack.c.l.s4 %v3144_v43  ;;  %vm943_vm3 = vcmask 1042434   ;;  %vm945_vm4 = vcmask 1043459  }
  0x8e   :  { %2634 = vmatprep.subr.bf16.mxu0 %v4117_v1  ;;  %2653 = vmatpush3.bf16.msra.mxu1 %v2754_v2  ;;  %v2759_v8 = vld [vmem:[#allocation9 + $0x18] sm:$0xff]   ;;  %v2761_v11 = vld [vmem:[#allocation9 + $0x20] sm:$0xff]   ;;  %v2763_v15 = vld [vmem:[#allocation9 + $0x28] sm:$0xff]   ;;  %vm947_vm5 = vcmask 1044484   ;;  %vm949_vm6 = vcmask 1045509   ;;  %vm951_vm7 = vcmask 1046534  }
  0x8f   :  { %2654 = vmatprep.subr.bf16.mxu1 %v2756_v4  ;;  %v3321_v13 = vld [vmem:[#allocation8] sm:$0xff]   ;;  %v2766_v16 = vld [vmem:[#allocation11 + $0x30] sm:$0xff]   ;;  %v3329_v17 = vsub.s32 0, %v3324_v14  ;;  %v3333_v19 = vsub.s32 1, %v3324_v14  ;;  %v2767_v20 = vld [vmem:[#allocation9 + $0x38] sm:$0xff]   ;;  %v3338_v23 = vsub.s32 2, %v3324_v14  ;;  %v491_v45 = vunpack.c.0.s8 %v490_v44 }
  0x90   :  { %2668 = vmatprep.mubr.bf16.mxu1 %v3321_v13  ;;  %v2765_v18 = vld [vmem:[#allocation9 + $0x30] sm:$0xff]   ;;  %v2768_v21 = vld [vmem:[#allocation11 + $0x38] sm:$0xff]   ;;  %v3346_v26 = vsub.s32 3, %v3324_v14  ;;  %v3349_v28 = vsub.s32 4, %v3324_v14  ;;  %v2770_v30 = vld [vmem:[#allocation8 + $0x8] sm:$0xff]   ;;  %v3361_v34 = vsub.s32 5, %v3324_v14 }
  0x91   :  { %2635 = vmatpush3.bf16.msra.mxu0 %v2755_v3  ;;  %v3335_v22 = vld [vmem:[#allocation2] sm:$0xff]  ;;  %v164_v27 = vld [vmem:[#allocation6] sm:$0xf]  ;;  %v2773_v36 = vld [vmem:[#allocation8 + $0x20] sm:$0xff]   ;;  %v3366_v38 = vsub.s32 6, %v3324_v14  ;;  %v3375_v47 = vsub.s32 %v491_v45, %v3324_v14  ;;  %vm953_vm8 = vcmask 1047559  }
  0x92   :  { %2636 = vmatprep.subr.bf16.mxu0 %v4117_v1  ;;  %2655 = vmatpush3.bf16.msra.mxu1 %v2756_v4  ;;  %v684_v24 = vrot.slane %v3335_v22, %v3329_v17  ;;  %v695_v25 = vrot.slane %v3335_v22, %v3333_v19  ;;  %v706_v29 = vrot.slane %v3335_v22, %v3338_v23  ;;  %v2771_v31 = vld [vmem:[#allocation8 + $0x10] sm:$0xff]   ;;  %v2772_v35 = vld [vmem:[#allocation8 + $0x18] sm:$0xff]   ;;  %v2774_v40 = vld [vmem:[#allocation8 + $0x28] sm:$0xff]   ;;  %vm956_vm9 = vcmask 130048   ;;  %s3146_s19 = smov [#allocation16]  }
  0x93   :  { %2656 = vmatprep.subr.bf16.mxu1 %v2758_v5  ;;  %v717_v32 = vrot.slane %v3335_v22, %v3346_v26  ;;  %v728_v33 = vrot.slane %v3335_v22, %v3349_v28  ;;  %v739_v37 = vrot.slane %v3335_v22, %v3361_v34  ;;  %v750_v39 = vrot.slane %v3335_v22, %v3366_v38  ;;  %v2775_v41 = vld [vmem:[#allocation8 + $0x30] sm:$0xff]   ;;  %v2776_v42 = vld [vmem:[#allocation8 + $0x38] sm:$0xff]   ;;  %s2524_s20 = sshll.u32 %s3146_s19, 4  ;;  %s2525_s20 = int_to_ptr.vmem [resolvable:$true] %s2524_s20 }
  0x94   :  { %690 = vbcast.lane.b32.xlu1 %v684_v24, 264  ;;  %686 = vbcast.lane.b32.xlu0 %v684_v24, 256  ;;  %v2537_v46 = vld [vmem:[%s4108_s4] ss:$0 sm:$0xff]  ;;  %4144 = vst [vmem:[#allocation23_spill] sm:$0xff] %v3375_v47  ;;  %s3098_s2 = scalar_lea.vmem %s2525_s20, 128  ;;  %p3103_p6 = scmp.lt.s32.totalorder %s2525_s20, %s2525_s20 }
  0x95   :  { %2637 = vmatpush3.bf16.msra.mxu0 %v2757_v6  ;;  %p3099_p5 = scmp.ne.s32.totalorder %s2525_s20, %s3098_s2  ;;  %p3104_p7 = scmp.lt.s32.totalorder %s3098_s2, %s3098_s2 }
  0x96   :  { %2638 = vmatprep.subr.bf16.mxu0 %v4117_v1  ;;  %2657 = vmatpush3.bf16.msra.mxu1 %v2758_v5 }
  0x97   :  { %2658 = vmatprep.subr.bf16.mxu1 %v2760_v7  ;;  %p3105_p8 = por %p3104_p7, %p3103_p6 }
  0x98   :  { %697 = vbcast.lane.b32.xlu1 %v695_v25, 256  ;;  %708 = vbcast.lane.b32.xlu0 %v706_v29, 256 }
  0x99   :  { %2639 = vmatpush3.bf16.msra.mxu0 %v2759_v8  ;;  %p3106_p9 = pnand %p3105_p8, %p3099_p5 }
  0x9a   :  { %2640 = vmatprep.subr.bf16.mxu0 %v4117_v1  ;;  %2659 = vmatpush3.bf16.msra.mxu1 %v2760_v7 }
  0x9b   :  { %2660 = vmatprep.subr.bf16.mxu1 %v2762_v9 }
  0x9c   :  { %701 = vbcast.lane.b32.xlu1 %v695_v25, 264  ;;  %719 = vbcast.lane.b32.xlu0 %v717_v32, 256 }
  0x9d   :  { %2641 = vmatpush3.bf16.msra.mxu0 %v2761_v11 }
  0x9e   :  { %2642 = vmatprep.subr.bf16.mxu0 %v4117_v1  ;;  %2661 = vmatpush3.bf16.msra.mxu1 %v2762_v9 }
  0x9f   :  { %2662 = vmatprep.subr.bf16.mxu1 %v2764_v12 }
  0xa0   :  { %712 = vbcast.lane.b32.xlu1 %v706_v29, 264  ;;  %730 = vbcast.lane.b32.xlu0 %v728_v33, 256 }
  0xa1   :  { %2643 = vmatpush3.bf16.msra.mxu0 %v2763_v15 }
  0xa2   :  { %2644 = vmatprep.subr.bf16.mxu0 %v4117_v1  ;;  %2663 = vmatpush3.bf16.msra.mxu1 %v2764_v12 }
  0xa3   :  { %2664 = vmatprep.subr.bf16.mxu1 %v2766_v16 }
  0xa4   :  { %723 = vbcast.lane.b32.xlu1 %v717_v32, 264  ;;  %741 = vbcast.lane.b32.xlu0 %v739_v37, 256  ;;  %v3424_v32 = vld [vmem:[%s4110_s6] ss:$0 sm:$0xff]  ;;  %s199_s6 = sld [smem:[#allocation15]] }
  0xa5   :  { %2645 = vmatpush3.bf16.msra.mxu0 %v2765_v18 }
  0xa6   :  { %2646 = vmatprep.subr.bf16.mxu0 %v4117_v1  ;;  %2665 = vmatpush3.bf16.msra.mxu1 %v2766_v16 }
  0xa7   :  { %2666 = vmatprep.subr.bf16.mxu1 %v2768_v21 }
  0xa8   :  { %734 = vbcast.lane.b32.xlu1 %v728_v33, 264  ;;  %752 = vbcast.lane.b32.xlu0 %v750_v39, 256 }
  0xa9   :  { %2647 = vmatpush3.bf16.msra.mxu0 %v2767_v20 }
  0xaa   :  { %2684 = vmatprep.subr.bf16.mxu0 %v4117_v1  ;;  %2667 = vmatpush3.bf16.msra.mxu1 %v2768_v21 }
  0xac   :  { %2649 = vmatmul.mubr.bf16.vlgmr.msra.gmra.mrb[0].mxu0 %v164_v27  ;;  %745 = vbcast.lane.b32.xlu1 %v739_v37, 264 }
  0xad   :  { %2700 = vmatprep.mubr.msk.bf16.mxu0 %vm3143_vm0, %v4117_v1  ;;  %2669 = vmatmul.mubr.bf16.vlgmr.msra.gmra.mrb[0].mxu1 %v2770_v30 }
  0xae   :  { %2672 = vmatprep.mubr.bf16.mxu1 %v2771_v31 }
  0xb0   :  { %756 = vbcast.lane.b32.xlu1 %v750_v39, 264 }
  0xb5   :  { %2673 = vmatmul.mubr.bf16.gmra.mrb[4].mxu1 %v2772_v35 }
  0xb6   :  { %2676 = vmatprep.mubr.bf16.mxu1 %v2773_v36 }
  0xbd   :  { %2677 = vmatmul.mubr.bf16.gmra.mrb[8].mxu1 %v2774_v40 }
  0xbe   :  { %2680 = vmatprep.mubr.bf16.mxu1 %v2775_v41 }
  0xc5   :  { %2681 = vmatmul.mubr.bf16.gmra.mrb[12].mxu1 %v2776_v42 }
  0xc6   :  { %2720 = vmatprep.mubr.bf16.mxu1 %v3321_v13 }
 0x17f   :  { %v288_v48 = vpop.f32.mrb[0].mxu0 }
 0x180   :  { %v3377_v49 = vadd.f32 %v2537_v46, %v288_v48  ;;  %v2650_v50 = vpop.f32.mrb[1].mxu0  ;;  %v3379_v52 = vpop.f32.mrb[0].mxu1 }
 0x181   :  { %v291_v51 = vpop.f32.mrb[2].mxu0  ;;  %v3385_v56 = vpop.f32.mrb[1].mxu1 }
 0x182   :  { %4145 = vst [vmem:[#allocation24_spill] sm:$0xff] %v3377_v49  ;;  %v488_v53 = vcombine.high %v3377_v49, %v3377_v49  ;;  %v495_v54 = vrot.slane %v3377_v49, %v3375_v47  ;;  %v2651_v55 = vpop.f32.mrb[3].mxu0  ;;  %v3387_v57 = vpop.f32.mrb[2].mxu1 }
 0x183   :  { %v3390_v60 = vpop.f32.mrb[3].mxu1 }
 0x184   :  { %v503_v58 = vcombine.high %v495_v54, %v495_v54  ;;  %v511_v59 = vrot.slane %v495_v54, %v3375_v47  ;;  %v502_v61 = vrot.slane %v488_v53, %v3375_v47 }
 0x186   :  { %v525_v62 = vrot.slane %v503_v58, %v3375_v47  ;;  %v540_v63 = vrot.slane %v511_v59, %v3329_v17  ;;  %v533_v0 = vcombine.high %v511_v59, %v511_v59  ;;  %v504_v12 = vcombine.high %v502_v61, %v502_v61 }
 0x187   :  { %v518_v31 = vrot.slane %v502_v61, %v3375_v47 }
 0x188   :  { %v544_v2 = vrot.slane %v525_v62, %v3329_v17  ;;  %v577_v3 = vadd.f32 %v540_v63, %v3385_v56  ;;  %v578_v4 = vadd.f32 %v540_v63, %v3390_v60  ;;  %v535_v5 = vcombine.high %v525_v62, %v525_v62  ;;  %v3398_v6 = vpop.f32.mrb[4].mxu1 }
 0x189   :  { %v548_v7 = vrot.slane %v533_v0, %v3329_v17  ;;  %v3403_v11 = vpop.f32.mrb[5].mxu1  ;;  %v532_v21 = vrot.slane %v504_v12, %v3375_v47  ;;  %v556_v42 = vrot.slane %v518_v31, %v3329_v17  ;;  %v534_v59 = vcombine.high %v518_v31, %v518_v31 }
 0x18a   :  { %v579_v8 = vadd.f32 %v3379_v52, %v544_v2  ;;  %2793 = vtanh.f32 %v577_v3  ;;  %v580_v9 = vadd.f32 %v3387_v57, %v544_v2  ;;  %v3405_v13 = vpop.f32.mrb[6].mxu1  ;;  %v552_v15 = vrot.slane %v535_v5, %v3329_v17 }
 0x18b   :  { %2795 = vtanh.f32 %v578_v4  ;;  %v581_v16 = vadd.f32 %v548_v7, %v3403_v11  ;;  %v3409_v18 = vpop.f32.mrb[7].mxu1  ;;  %v560_v29 = vrot.slane %v532_v21, %v3329_v17  ;;  %v536_v44 = vcombine.high %v532_v21, %v532_v21 }
 0x18c   :  { %2797 = vtanh.f32 %v579_v8  ;;  %v582_v20 = vadd.f32 %v548_v7, %v3409_v18  ;;  %v583_v24 = vadd.f32 %v3398_v6, %v552_v15  ;;  %v584_v27 = vadd.f32 %v3405_v13, %v552_v15 }
 0x18d   :  { %2799 = vtanh.f32 %v580_v9  ;;  %v568_v55 = vrot.slane %v536_v44, %v3329_v17  ;;  %v564_v5 = vrot.slane %v534_v59, %v3329_v17 }
 0x18e   :  { %2801 = vtanh.f32 %v581_v16 }
 0x18f   :  { %2803 = vtanh.f32 %v582_v20 }
 0x190   :  { %v3414_v25 = vpop.f32.mrb[8].mxu1  ;;  %2805 = vtanh.f32 %v583_v24 }
 0x191   :  { %v3418_v30 = vpop.f32.mrb[9].mxu1  ;;  %v587_v36 = vadd.f32 %v3414_v25, %v560_v29  ;;  %2807 = vtanh.f32 %v584_v27 }
 0x192   :  { %v3426_v33 = vpop.f32.mrb[10].mxu1  ;;  %v585_v48 = vadd.f32 %v556_v42, %v3418_v30 }
 0x193   :  { %v3429_v37 = vpop.f32.mrb[11].mxu1  ;;  %v588_v43 = vadd.f32 %v3426_v33, %v560_v29  ;;  %2809 = vtanh.f32 %v587_v36 }
 0x194   :  { %v2794_v35 = vpop.eup %2793  ;;  %v586_v54 = vadd.f32 %v556_v42, %v3429_v37 }
 0x195   :  { %v2796_v39 = vpop.eup %2795  ;;  %v615_v40 = vmul.f32 %v2794_v35, %v3424_v32  ;;  %2811 = vtanh.f32 %v588_v43 }
 0x196   :  { %v2798_v41 = vpop.eup %2797  ;;  %v616_v51 = vmul.f32 %v2796_v39, %v3424_v32  ;;  %2813 = vtanh.f32 %v585_v48 }
 0x197   :  { %631 = vadd.xlane.f32.xlu0 %v615_v40  ;;  %v617_v45 = vmul.f32 %v2798_v41, %v3424_v32  ;;  %v2800_v46 = vpop.eup %2799  ;;  %2815 = vtanh.f32 %v586_v54  ;;  %v3145_v40 = vmov 0  }
 0x198   :  { %v3436_v50 = vpop.f32.mrb[12].mxu1  ;;  %v2802_v53 = vpop.eup %2801  ;;  %v618_v62 = vmul.f32 %v2800_v46, %v3424_v32  ;;  %2751 = vset.pattern.permute.xlu0 %v3145_v40  ;;  %2752 = vset.pattern.permute.xlu1 %v3145_v40 }
 0x199   :  { %4146 = vst [vmem:[#allocation25_spill] sm:$0xff] %v3436_v50  ;;  %635 = vadd.xlane.f32.xlu1 %v617_v45  ;;  %v3441_v58 = vpop.f32.mrb[13].mxu1  ;;  %v2804_v63 = vpop.eup %2803  ;;  %v591_v0 = vadd.f32 %v3436_v50, %v568_v55  ;;  %v619_v3 = vmul.f32 %v2802_v53, %v3424_v32  ;;  %v3466_v53 = vsub.s32 7, %v3324_v14 }
 0x19a   :  { %v3443_v61 = vpop.f32.mrb[14].mxu1  ;;  %v2806_v4 = vpop.eup %2805  ;;  %v620_v8 = vmul.f32 %v2804_v63, %v3424_v32  ;;  %v589_v12 = vadd.f32 %v564_v5, %v3441_v58 }
 0x19b   :  { %4147 = vst [vmem:[#allocation26_spill] sm:$0xff] %v3443_v61  ;;  %633 = vadd.xlane.f32.xlu0 %v616_v51  ;;  %v3447_v2 = vpop.f32.mrb[15].mxu1  ;;  %v592_v7 = vadd.f32 %v3443_v61, %v568_v55  ;;  %v2808_v9 = vpop.eup %2807  ;;  %2817 = vtanh.f32 %v591_v0  ;;  %v621_v15 = vmul.f32 %v2806_v4, %v3424_v32  ;;  %v761_v54 = vrot.slane %v3335_v22, %v3466_v53 }
 0x19c   :  { %v590_v20 = vadd.f32 %v564_v5, %v3447_v2  ;;  %v622_v21 = vmul.f32 %v2808_v9, %v3424_v32  ;;  %v3470_v55 = vpop.permute.xlu1 %690 }
 0x19d   :  { %637 = vadd.xlane.f32.xlu1 %v618_v62  ;;  %v2810_v16 = vpop.eup %2809  ;;  %2819 = vtanh.f32 %v592_v7  ;;  %4148 = vst [vmem:[#allocation27_spill] sm:$0xff] %v3470_v55  ;;  %v3474_v62 = vpop.permute.xlu0 %686 }
 0x19e   :  { %2821 = vtanh.f32 %v589_v12  ;;  %v625_v27 = vmul.f32 %v2810_v16, %v3424_v32  ;;  %4150 = vst [vmem:[#allocation29_spill] sm:$0xff] %v3474_v62 }
 0x19f   :  { %639 = vadd.xlane.f32.xlu0 %v619_v3  ;;  %v2812_v24 = vpop.eup %2811  ;;  %2823 = vtanh.f32 %v590_v20 }
 0x1a0   :  { %v2814_v29 = vpop.eup %2813  ;;  %v626_v31 = vmul.f32 %v2812_v24, %v3424_v32  ;;  %v3472_v59 = vpop.permute.xlu1 %697 }
 0x1a1   :  { %641 = vadd.xlane.f32.xlu1 %v620_v8  ;;  %v2816_v35 = vpop.eup %2815  ;;  %v623_v36 = vmul.f32 %v2814_v29, %v3424_v32  ;;  %4149 = vst [vmem:[#allocation28_spill] sm:$0xff] %v3472_v59  ;;  %v3478_v0 = vpop.permute.xlu0 %708 }
 0x1a2   :  { %v624_v41 = vmul.f32 %v2816_v35, %v3424_v32  ;;  %4152 = vst [vmem:[#allocation31_spill] sm:$0xff] %v3478_v0 }
 0x1a3   :  { %643 = vadd.xlane.f32.xlu0 %v621_v15  ;;  %v663_v15 = vstv %s199_s6 }
 0x1a4   :  { %v3476_v63 = vpop.permute.xlu1 %701 }
 0x1a5   :  { %645 = vadd.xlane.f32.xlu1 %v622_v21  ;;  %v2818_v39 = vpop.eup %2817  ;;  %4151 = vst [vmem:[#allocation30_spill] sm:$0xff] %v3476_v63  ;;  %v3482_v3 = vpop.permute.xlu0 %719 }
 0x1a6   :  { %v629_v43 = vmul.f32 %v2818_v39, %v3424_v32  ;;  %4154 = vst [vmem:[#allocation33_spill] sm:$0xff] %v3482_v3 }
 0x1a7   :  { %651 = vadd.xlane.f32.xlu0 %v625_v27  ;;  %v2820_v42 = vpop.eup %2819 }
 0x1a8   :  { %v2822_v44 = vpop.eup %2821  ;;  %v630_v45 = vmul.f32 %v2820_v42, %v3424_v32 }
 0x1a9   :  { %653 = vadd.xlane.f32.xlu1 %v626_v31  ;;  %v2824_v46 = vpop.eup %2823  ;;  %v627_v48 = vmul.f32 %v2822_v44, %v3424_v32  ;;  %v3486_v5 = vpop.permute.xlu0 %730 }
 0x1aa   :  { %v628_v51 = vmul.f32 %v2824_v46, %v3424_v32  ;;  %v3480_v32 = vpop.permute.xlu1 %712  ;;  %4156 = vst [vmem:[#allocation35_spill] sm:$0xff] %v3486_v5 }
 0x1ab   :  { %647 = vadd.xlane.f32.xlu0 %v623_v36  ;;  %4153 = vst [vmem:[#allocation32_spill] sm:$0xff] %v3480_v32 }
 0x1ad   :  { %649 = vadd.xlane.f32.xlu1 %v624_v41  ;;  %v3490_v7 = vpop.permute.xlu0 %741 }
 0x1ae   :  { %v3484_v4 = vpop.permute.xlu1 %723  ;;  %4158 = vst [vmem:[#allocation37_spill] sm:$0xff] %v3490_v7 }
 0x1af   :  { %659 = vadd.xlane.f32.xlu0 %v629_v43  ;;  %4155 = vst [vmem:[#allocation34_spill] sm:$0xff] %v3484_v4 }
 0x1b1   :  { %661 = vadd.xlane.f32.xlu1 %v630_v45  ;;  %v3494_v9 = vpop.permute.xlu0 %752 }
 0x1b2   :  { %v3488_v22 = vpop.permute.xlu1 %734  ;;  %4160 = vst [vmem:[#allocation39_spill] sm:$0xff] %v3494_v9 }
 0x1b3   :  { %655 = vadd.xlane.f32.xlu0 %v627_v48  ;;  %4157 = vst [vmem:[#allocation36_spill] sm:$0xff] %v3488_v22 }
 0x1b5   :  { %657 = vadd.xlane.f32.xlu1 %v628_v51 }
 0x1b6   :  { %v3492_v8 = vpop.permute.xlu1 %745 }
 0x1b7   :  { %4159 = vst [vmem:[#allocation38_spill] sm:$0xff] %v3492_v8 }
 0x1ba   :  { %v3496_v12 = vpop.permute.xlu1 %756 }
 0x1bb   :  { %4161 = vst [vmem:[#allocation40_spill] sm:$0xff] %v3496_v12 }
 0x1c6   :  { %767 = vbcast.lane.b32.xlu1 %v761_v54, 264 }
 0x1c9   :  { %763 = vbcast.lane.b32.xlu0 %v761_v54, 256 }
 0x224   :  { %v632_v16 = vpop.xlane.xlu0 %631 }
 0x225   :  { %v664_v20 = vadd.f32 %v663_v15, %v632_v16 }
 0x226   :  { %v636_v21 = vpop.xlane.xlu1 %635 }
 0x227   :  { %v3499_v24 = vadd.f32 %v3474_v62, %v664_v20  ;;  %v666_v35 = vadd.f32 %v663_v15, %v636_v21 }
 0x228   :  { %v634_v27 = vpop.xlane.xlu0 %633 }
 0x229   :  { %v665_v29 = vadd.f32 %v663_v15, %v634_v27  ;;  %818 = vperm.xlu0 %2751, %v3499_v24   ;;  %v3510_v43 = vadd.f32 %v3472_v59, %v666_v35 }
 0x22a   :  { %v638_v31 = vpop.xlane.xlu1 %637 }
 0x22b   :  { %v3503_v36 = vadd.f32 %v3470_v55, %v665_v29  ;;  %v667_v39 = vadd.f32 %v663_v15, %v638_v31 }
 0x22c   :  { %v640_v40 = vpop.xlane.xlu0 %639 }
 0x22d   :  { %v3506_v41 = vadd.f32 %v3476_v63, %v667_v39  ;;  %821 = vperm.xlu1 %2752, %v3503_v36   ;;  %v668_v44 = vadd.f32 %v663_v15, %v640_v40 }
 0x22e   :  { %v642_v42 = vpop.xlane.xlu1 %641 }
 0x22f   :  { %v669_v45 = vadd.f32 %v663_v15, %v642_v42  ;;  %827 = vperm.xlu0 %2751, %v3506_v41   ;;  %v3518_v54 = vadd.f32 %v3478_v0, %v668_v44 }
 0x230   :  { %v644_v46 = vpop.xlane.xlu0 %643 }
 0x231   :  { %v3514_v48 = vadd.f32 %v3480_v32, %v669_v45  ;;  %824 = vperm.xlu1 %2752, %v3510_v43   ;;  %v670_v16 = vadd.f32 %v663_v15, %v644_v46 }
 0x232   :  { %v646_v51 = vpop.xlane.xlu1 %645 }
 0x233   :  { %v671_v20 = vadd.f32 %v663_v15, %v646_v51  ;;  %833 = vperm.xlu0 %2751, %v3514_v48   ;;  %v3526_v31 = vadd.f32 %v3482_v3, %v670_v16 }
 0x234   :  { %v652_v21 = vpop.xlane.xlu0 %651 }
 0x235   :  { %v3522_v27 = vadd.f32 %v3484_v4, %v671_v20  ;;  %830 = vperm.xlu1 %2752, %v3518_v54   ;;  %v674_v35 = vadd.f32 %v663_v15, %v652_v21 }
 0x236   :  { %v654_v29 = vpop.xlane.xlu1 %653 }
 0x237   :  { %v675_v39 = vadd.f32 %v663_v15, %v654_v29  ;;  %839 = vperm.xlu0 %2751, %v3522_v27   ;;  %v3534_v45 = vadd.f32 %v3490_v7, %v674_v35 }
 0x238   :  { %v648_v40 = vpop.xlane.xlu0 %647 }
 0x239   :  { %v3530_v42 = vadd.f32 %v3492_v8, %v675_v39  ;;  %836 = vperm.xlu1 %2752, %v3526_v31   ;;  %v672_v46 = vadd.f32 %v663_v15, %v648_v40 }
 0x23a   :  { %v650_v44 = vpop.xlane.xlu1 %649 }
 0x23b   :  { %v673_v51 = vadd.f32 %v663_v15, %v650_v44  ;;  %851 = vperm.xlu0 %2751, %v3530_v42   ;;  %v3542_v29 = vadd.f32 %v3486_v5, %v672_v46 }
 0x23c   :  { %v660_v16 = vpop.xlane.xlu0 %659 }
 0x23d   :  { %v3538_v20 = vadd.f32 %v3488_v22, %v673_v51  ;;  %848 = vperm.xlu1 %2752, %v3534_v45   ;;  %v678_v51 = vadd.f32 %v663_v15, %v660_v16 }
 0x23e   :  { %v662_v21 = vpop.xlane.xlu1 %661 }
 0x23f   :  { %845 = vperm.xlu0 %2751, %v3538_v20   ;;  %v679_v7 = vadd.f32 %v663_v15, %v662_v21 }
 0x240   :  { %v656_v39 = vpop.xlane.xlu0 %655 }
 0x241   :  { %v676_v1 = vadd.f32 %v663_v15, %v656_v39  ;;  %842 = vperm.xlu1 %2752, %v3542_v29  }
 0x242   :  { %v658_v35 = vpop.xlane.xlu1 %657 }
 0x243   :  { %v3547_v40 = vadd.f32 %v3494_v9, %v676_v1  ;;  %v677_v44 = vadd.f32 %v663_v15, %v658_v35  ;;  %v4164_v15 = vlaneseq }
 0x244   :  { %v3549_v10 = vpop.permute.xlu0 %763 }
 0x245   :  { %4162 = vst [vmem:[#allocation41_spill] sm:$0xff] %v3549_v10  ;;  %v3552_v8 = vadd.f32 %v3496_v12, %v677_v44  ;;  %854 = vperm.xlu1 %2752, %v3547_v40   ;;  %v3558_v39 = vadd.f32 %v3549_v10, %v678_v51  ;;  %v866_v21 = vand.u32 127, %v4164_v15 }
 0x246   :  { %v3555_v46 = vpop.permute.xlu1 %767 }
 0x247   :  { %4163 = vst [vmem:[#allocation42_spill] sm:$0xff] %v3555_v46  ;;  %857 = vperm.xlu0 %2751, %v3552_v8   ;;  %v3562_v1 = vadd.f32 %v3555_v46, %v679_v7  ;;  %v871_v10 = vadd.s32 4294967288, %v866_v21  ;;  %v3568_v7 = vsub.s32 %v866_v21, %v3324_v14 }
 0x249   :  { %860 = vperm.xlu1 %2752, %v3558_v39   ;;  %v3571_v46 = vsub.s32 %v871_v10, %v3324_v14 }
 0x24b   :  { %863 = vperm.xlu0 %2751, %v3562_v1  }
 0x2a8   :  { %v819_v16 = vpop.permute.xlu0 %818 }
 0x2a9   :  { %v870_v10 = vrot.slane %v819_v16, %v3568_v7 }
 0x2ac   :  { %v822_v35 = vpop.permute.xlu1 %821 }
 0x2ad   :  { %v875_v59 = vrot.slane %v822_v35, %v3571_v46 }
 0x2ae   :  { %v828_v44 = vpop.permute.xlu0 %827 }
 0x2af   :  { %v885_v55 = vrot.slane %v828_v44, %v3571_v46 }
 0x2b0   :  { %v825_v12 = vpop.permute.xlu1 %824 }
 0x2b1   :  { %v881_v32 = vrot.slane %v825_v12, %v3568_v7 }
 0x2b2   :  { %v834_v9 = vpop.permute.xlu0 %833 }
 0x2b3   :  { %v894_v47 = vrot.slane %v834_v9, %v3571_v46  ;;  %v886_v14 = vsel %vm876_vm1, %v885_v55, %v881_v32 }
 0x2b4   :  { %v831_v4 = vpop.permute.xlu1 %830 }
 0x2b5   :  { %v890_v0 = vrot.slane %v831_v4, %v3568_v7 }
 0x2b6   :  { %v840_v3 = vpop.permute.xlu0 %839 }
 0x2b7   :  { %v903_v4 = vrot.slane %v840_v3, %v3571_v46  ;;  %v895_v12 = vsel %vm876_vm1, %v894_v47, %v890_v0 }
 0x2b8   :  { %v837_v51 = vpop.permute.xlu1 %836 }
 0x2b9   :  { %v899_v15 = vrot.slane %v837_v51, %v3568_v7  ;;  %v877_v51 = vsel %vm876_vm1, %v875_v59, %v870_v10 }
 0x2ba   :  { %v852_v22 = vpop.permute.xlu0 %851 }
 0x2bb   :  { %v904_v9 = vsel %vm876_vm1, %v903_v4, %v899_v15  ;;  %v921_v3 = vrot.slane %v852_v22, %v3571_v46 }
 0x2bc   :  { %v849_v5 = vpop.permute.xlu1 %848 }
 0x2bd   :  { %v917_v32 = vrot.slane %v849_v5, %v3568_v7 }
 0x2be   :  { %v846_v62 = vpop.permute.xlu0 %845 }
 0x2bf   :  { %v912_v35 = vrot.slane %v846_v62, %v3571_v46 }
 0x2c0   :  { %v843_v63 = vpop.permute.xlu1 %842 }
 0x2c1   :  { %v908_v21 = vrot.slane %v843_v63, %v3568_v7  ;;  %v942_v63 = vsel %vm941_vm2, %v886_v14, %v877_v51  ;;  %v922_v14 = vsel %vm876_vm1, %v921_v3, %v917_v32 }
 0x2c2   :  { %v944_v55 = vsel %vm943_vm3, %v895_v12, %v942_v63 }
 0x2c3   :  { %v913_v16 = vsel %vm876_vm1, %v912_v35, %v908_v21  ;;  %v946_v62 = vsel %vm945_vm4, %v904_v9, %v944_v55 }
 0x2c4   :  { %v855_v44 = vpop.permute.xlu1 %854  ;;  %v948_v15 = vsel %vm947_vm5, %v913_v16, %v946_v62 }
 0x2c5   :  { %v926_v0 = vrot.slane %v855_v44, %v3568_v7  ;;  %v950_v4 = vsel %vm949_vm6, %v922_v14, %v948_v15 }
 0x2c6   :  { %v858_v49 = vpop.permute.xlu0 %857 }
 0x2c7   :  { %v930_v47 = vrot.slane %v858_v49, %v3571_v46 }
 0x2c8   :  { %v861_v59 = vpop.permute.xlu1 %860 }
 0x2c9   :  { %v931_v21 = vsel %vm876_vm1, %v930_v47, %v926_v0  ;;  %v935_v5 = vrot.slane %v861_v59, %v3568_v7 }
 0x2ca   :  { %v864_v10 = vpop.permute.xlu0 %863  ;;  %v952_v22 = vsel %vm951_vm7, %v931_v21, %v950_v4 }
 0x2cb   :  { %v939_v49 = vrot.slane %v864_v10, %v3571_v46 }
 0x2cd   :  { %v940_v12 = vsel %vm876_vm1, %v939_v49, %v935_v5 }
 0x2ce   :  { %v954_v35 = vsel %vm953_vm8, %v940_v12, %v952_v22 }
 0x2cf   :  { %v957_v44 = vsel %vm956_vm9, %v954_v35, -inf }
 0x2d0   :  { %958 = vmax.xlane.f32.xlu1 %v957_v44 }
 0x35d   :  { %v959_v51 = vpop.xlane.xlu1 %958 }
 0x35e   :  { %v964_v9 = vrot.slane %v959_v51, %v3329_v17  ;;  %v980_v63 = vrot.slane %v959_v51, %v3349_v28  ;;  %v3608_v16 = vrot.slane %v959_v51, %v3466_v53  ;;  %v968_v55 = vrot.slane %v959_v51, %v3333_v19 }
 0x35f   :  { %v972_v14 = vrot.slane %v959_v51, %v3338_v23 }
 0x360   :  { %v1001_v32 = vsub.f32 %v3499_v24, %v964_v9  ;;  %v1002_v47 = vsub.f32 %v3503_v36, %v964_v9  ;;  %v1010_v62 = vsub.f32 %v3538_v20, %v980_v63  ;;  %v1016_v0 = vsub.f32 %v3562_v1, %v3608_v16 }
 0x361   :  { %v1003_v10 = vsub.f32 %v3510_v43, %v968_v55  ;;  %v1004_v24 = vsub.f32 %v3506_v41, %v968_v55  ;;  %v1005_v20 = vsub.f32 %v3518_v54, %v972_v14  ;;  %v976_v43 = vrot.slane %v959_v51, %v3346_v26 }
 0x362   :  { %v1017_v59 = vmul.f32 1.442695, %v1001_v32  ;;  %v1035_v3 = vmul.f32 1.442695, %v1010_v62  ;;  %v1019_v15 = vmul.f32 1.442695, %v1002_v47  ;;  %v1006_v12 = vsub.f32 %v3514_v48, %v972_v14 }
 0x363   :  { %v1047_v21 = vmul.f32 1.442695, %v1016_v0  ;;  %v1021_v5 = vmul.f32 1.442695, %v1003_v10  ;;  %v1023_v36 = vmul.f32 1.442695, %v1004_v24  ;;  %v1007_v35 = vsub.f32 %v3526_v31, %v976_v43 }
 0x364   :  { %2825 = vpow2.f32 %v1017_v59  ;;  %v1025_v4 = vmul.f32 1.442695, %v1005_v20  ;;  %v1027_v54 = vmul.f32 1.442695, %v1006_v12  ;;  %v1008_v48 = vsub.f32 %v3522_v27, %v976_v43 }
 0x365   :  { %2827 = vpow2.f32 %v1035_v3  ;;  %v1029_v9 = vmul.f32 1.442695, %v1007_v35  ;;  %v984_v32 = vrot.slane %v959_v51, %v3361_v34  ;;  %v1009_v62 = vsub.f32 %v3542_v29, %v980_v63 }
 0x366   :  { %2829 = vpow2.f32 %v1019_v15  ;;  %v1031_v47 = vmul.f32 1.442695, %v1008_v48  ;;  %v988_v27 = vrot.slane %v959_v51, %v3366_v38  ;;  %v1015_v24 = vsub.f32 %v3558_v39, %v3608_v16 }
 0x367   :  { %2831 = vpow2.f32 %v1047_v21  ;;  %v1033_v31 = vmul.f32 1.442695, %v1009_v62  ;;  %v1011_v59 = vsub.f32 %v3534_v45, %v984_v32  ;;  %v1012_v10 = vsub.f32 %v3530_v42, %v984_v32 }
 0x368   :  { %2833 = vpow2.f32 %v1021_v5  ;;  %v1013_v63 = vsub.f32 %v3547_v40, %v988_v27  ;;  %v1014_v51 = vsub.f32 %v3552_v8, %v988_v27  ;;  %v1045_v40 = vmul.f32 1.442695, %v1015_v24 }
 0x369   :  { %2835 = vpow2.f32 %v1023_v36  ;;  %v1037_v15 = vmul.f32 1.442695, %v1011_v59  ;;  %v1039_v29 = vmul.f32 1.442695, %v1012_v10 }
 0x36a   :  { %2837 = vpow2.f32 %v1025_v4  ;;  %v1041_v45 = vmul.f32 1.442695, %v1013_v63  ;;  %v1043_v42 = vmul.f32 1.442695, %v1014_v51 }
 0x36b   :  { %2839 = vpow2.f32 %v1027_v54 }
 0x36c   :  { %2841 = vpow2.f32 %v1029_v9 }
 0x36d   :  { %2843 = vpow2.f32 %v1031_v47 }
 0x36e   :  { %v3620_v1 = vpop.eup %2825  ;;  %2845 = vpow2.f32 %v1033_v31 }
 0x36f   :  { %v3622_v49 = vpop.eup %2827  ;;  %1066 = vperm.xlu0 %2751, %v3620_v1   ;;  %2847 = vpow2.f32 %v1037_v15 }
 0x370   :  { %1093 = vperm.xlu1 %2752, %v3622_v49   ;;  %v3628_v41 = vpop.eup %2829  ;;  %2849 = vpow2.f32 %v1039_v29 }
 0x371   :  { %v3630_v22 = vpop.eup %2831  ;;  %2851 = vpow2.f32 %v1041_v45 }
 0x372   :  { %v3635_v44 = vpop.eup %2833  ;;  %2853 = vpow2.f32 %v1043_v42 }
 0x373   :  { %1069 = vperm.xlu0 %2751, %v3628_v41   ;;  %v3639_v55 = vpop.eup %2835  ;;  %2855 = vpow2.f32 %v1045_v40 }
 0x374   :  { %1111 = vperm.xlu1 %2752, %v3630_v22   ;;  %v3644_v0 = vpop.eup %2837 }
 0x375   :  { %v3648_v3 = vpop.eup %2839 }
 0x376   :  { %v3653_v21 = vpop.eup %2841 }
 0x377   :  { %1072 = vperm.xlu0 %2751, %v3635_v44   ;;  %v3657_v14 = vpop.eup %2843 }
 0x378   :  { %v3661_v5 = vpop.eup %2845 }
 0x379   :  { %v3666_v36 = vpop.eup %2847 }
 0x37a   :  { %v3669_v20 = vpop.eup %2849 }
 0x37b   :  { %1075 = vperm.xlu0 %2751, %v3639_v55   ;;  %v3672_v8 = vpop.eup %2851 }
 0x37c   :  { %v3675_v43 = vpop.eup %2853 }
 0x37d   :  { %v3678_v39 = vpop.eup %2855 }
 0x37f   :  { %1078 = vperm.xlu0 %2751, %v3644_v0  }
 0x383   :  { %1081 = vperm.xlu0 %2751, %v3648_v3  }
 0x387   :  { %1084 = vperm.xlu0 %2751, %v3653_v21  }
 0x38b   :  { %1087 = vperm.xlu0 %2751, %v3657_v14  }
 0x38f   :  { %1090 = vperm.xlu0 %2751, %v3661_v5  }
 0x393   :  { %1096 = vperm.xlu0 %2751, %v3666_v36  }
 0x397   :  { %1099 = vperm.xlu0 %2751, %v3669_v20  }
 0x39b   :  { %1102 = vperm.xlu0 %2751, %v3672_v8  }
 0x39f   :  { %1105 = vperm.xlu0 %2751, %v3675_v43  }
 0x3a3   :  { %1108 = vperm.xlu0 %2751, %v3678_v39  }
 0x3ee   :  { %v1067_v16 = vpop.permute.xlu0 %1066 }
 0x3ef   :  { %v1094_v27 = vpop.permute.xlu1 %1093  ;;  %v1116_v24 = vrot.slane %v1067_v16, %v3568_v7 }
 0x3f2   :  { %v1070_v4 = vpop.permute.xlu0 %1069 }
 0x3f3   :  { %v1120_v29 = vrot.slane %v1070_v4, %v3571_v46  ;;  %v1112_v16 = vpop.permute.xlu1 %1111 }
 0x3f6   :  { %v1073_v12 = vpop.permute.xlu0 %1072 }
 0x3f7   :  { %v1125_v63 = vrot.slane %v1073_v12, %v3568_v7  ;;  %v1121_v12 = vsel %vm876_vm1, %v1120_v29, %v1116_v24 }
 0x3fa   :  { %v1076_v54 = vpop.permute.xlu0 %1075 }
 0x3fb   :  { %v1129_v59 = vrot.slane %v1076_v54, %v3571_v46 }
 0x3fd   :  { %v1130_v40 = vsel %vm876_vm1, %v1129_v59, %v1125_v63 }
 0x3fe   :  { %v1079_v35 = vpop.permute.xlu0 %1078  ;;  %v1185_v59 = vsel %vm941_vm2, %v1130_v40, %v1121_v12 }
 0x3ff   :  { %v1134_v51 = vrot.slane %v1079_v35, %v3568_v7 }
 0x402   :  { %v1082_v9 = vpop.permute.xlu0 %1081 }
 0x403   :  { %v1138_v15 = vrot.slane %v1082_v9, %v3571_v46  ;;  %v1156_v9 = vrot.slane %v1094_v27, %v3571_v46 }
 0x405   :  { %v1139_v4 = vsel %vm876_vm1, %v1138_v15, %v1134_v51 }
 0x406   :  { %v1085_v48 = vpop.permute.xlu0 %1084  ;;  %v1186_v27 = vsel %vm943_vm3, %v1139_v4, %v1185_v59 }
 0x407   :  { %v1143_v54 = vrot.slane %v1085_v48, %v3568_v7 }
 0x40a   :  { %v1088_v32 = vpop.permute.xlu0 %1087 }
 0x40b   :  { %v1147_v45 = vrot.slane %v1088_v32, %v3571_v46 }
 0x40d   :  { %v1148_v32 = vsel %vm876_vm1, %v1147_v45, %v1143_v54 }
 0x40e   :  { %v1091_v47 = vpop.permute.xlu0 %1090  ;;  %v1187_v63 = vsel %vm945_vm4, %v1148_v32, %v1186_v27 }
 0x40f   :  { %v1152_v42 = vrot.slane %v1091_v47, %v3568_v7 }
 0x411   :  { %v1157_v48 = vsel %vm876_vm1, %v1156_v9, %v1152_v42 }
 0x412   :  { %v1097_v62 = vpop.permute.xlu0 %1096 }
 0x413   :  { %v1161_v35 = vrot.slane %v1097_v62, %v3568_v7  ;;  %v1183_v62 = vrot.slane %v1112_v16, %v3571_v46 }
 0x416   :  { %v1100_v31 = vpop.permute.xlu0 %1099 }
 0x417   :  { %v1165_v50 = vrot.slane %v1100_v31, %v3571_v46 }
 0x419   :  { %v1166_v15 = vsel %vm876_vm1, %v1165_v50, %v1161_v35 }
 0x41a   :  { %v1103_v10 = vpop.permute.xlu0 %1102 }
 0x41b   :  { %v1170_v31 = vrot.slane %v1103_v10, %v3568_v7 }
 0x41e   :  { %v1106_v61 = vpop.permute.xlu0 %1105 }
 0x41f   :  { %v1174_v47 = vrot.slane %v1106_v61, %v3571_v46  ;;  %v1188_v61 = vsel %vm947_vm5, %v1157_v48, %v1187_v63 }
 0x420   :  { %v1189_v24 = vsel %vm949_vm6, %v1166_v15, %v1188_v61 }
 0x421   :  { %v1175_v29 = vsel %vm876_vm1, %v1174_v47, %v1170_v31 }
 0x422   :  { %v1109_v45 = vpop.permute.xlu0 %1108  ;;  %v1190_v10 = vsel %vm951_vm7, %v1175_v29, %v1189_v24  ;;  %v2784_v24 = vld [vmem:[#allocation14 + $0x28] sm:$0xff]  }
 0x423   :  { %v1179_v51 = vrot.slane %v1109_v45, %v3568_v7 }
 0x425   :  { %v1184_v42 = vsel %vm876_vm1, %v1183_v62, %v1179_v51  ;;  %v2779_v62 = vld [vmem:[#allocation14 + $0x10] sm:$0xff]   ;;  %v2782_v51 = vld [vmem:[#allocation14 + $0x20] sm:$0xff]  }
 0x426   :  { %v1191_v40 = vsel %vm953_vm8, %v1184_v42, %v1190_v10  ;;  %v4165_v42 = vmov 0.0   ;;  %v2787_v10 = vld [vmem:[#allocation12 + $0x18] sm:$0xff]  }
 0x427   :  { %v1193_v50 = vsel %vm956_vm9, %v1191_v40, 0.0  ;;  %v2788_v40 = vld [vmem:[#allocation14 + $0x38] sm:$0xff]  }
 0x428   :  { %1194 = vadd.xlane.f32.xlu0 %v1193_v50  ;;  %v2789_v50 = vld [vmem:[#allocation12 + $0x20] sm:$0xff]  }
 0x4b5   :  { %v1195_v54 = vpop.xlane.xlu0 %1194 }
 0x4b6   :  { %2857 = vrcp.f32 %v1195_v54  ;;  %v2925_v54 = vld [vmem:[#allocation8 + $0x8] sm:$0xff]  }
 0x4c0   :  { %v2858_v9 = vpop.eup %2857 }
 0x4c1   :  { %v1217_v4 = vrot.slane %v2858_v9, %v3349_v28  ;;  %v1201_v12 = vrot.slane %v2858_v9, %v3329_v17  ;;  %v1229_v47 = vrot.slane %v2858_v9, %v3466_v53  ;;  %v1205_v48 = vrot.slane %v2858_v9, %v3333_v19 }
 0x4c2   :  { %v1225_v45 = vrot.slane %v2858_v9, %v3366_v38 }
 0x4c3   :  { %v1246_v32 = vmul.f32 %v3661_v5, %v1217_v4  ;;  %v1238_v35 = vmul.f32 %v3620_v1, %v1201_v12  ;;  %v1253_v16 = vmul.f32 %v3630_v22, %v1229_v47  ;;  %v1239_v59 = vmul.f32 %v3628_v41, %v1201_v12  ;;  %v2791_v12 = vld [vmem:[#allocation12 + $0x30] sm:$0xff]  }
 0x4c4   :  { %v1240_v31 = vmul.f32 %v3635_v44, %v1205_v48  ;;  %v1241_v27 = vmul.f32 %v3639_v55, %v1205_v48  ;;  %v1209_v5 = vrot.slane %v2858_v9, %v3338_v23  ;;  %v1213_v22 = vrot.slane %v2858_v9, %v3346_v26  ;;  %v2931_v48 = vld [vmem:[#allocation8 + $0x38] sm:$0xff]  }
 0x4c5   :  { %1296 = vperm.xlu0 %2751, %v1246_v32   ;;  %1256 = vperm.xlu1 %2752, %v1238_v35   ;;  %v1247_v44 = vmul.f32 %v3622_v49, %v1217_v4  ;;  %v1221_v55 = vrot.slane %v2858_v9, %v3361_v34  ;;  %v1251_v49 = vmul.f32 %v3675_v43, %v1225_v45  ;;  %v2785_v43 = vld [vmem:[#allocation12 + $0x10] sm:$0xff]   ;;  %v2790_v9 = vld [vmem:[#allocation12 + $0x28] sm:$0xff]   ;;  %v2927_v32 = vld [vmem:[#allocation8 + $0x18] sm:$0xff]  }
 0x4c6   :  { %v1242_v1 = vmul.f32 %v3644_v0, %v1209_v5  ;;  %v1243_v15 = vmul.f32 %v3648_v3, %v1209_v5  ;;  %v1244_v41 = vmul.f32 %v3653_v21, %v1213_v22  ;;  %v1245_v63 = vmul.f32 %v3657_v14, %v1213_v22  ;;  %v2777_v0 = vld [vmem:[#allocation14] sm:$0xff]   ;;  %v2778_v14 = vld [vmem:[#allocation14 + $0x8] sm:$0xff]   ;;  %v2926_v4 = vld [vmem:[#allocation8 + $0x10] sm:$0xff]  }
 0x4c7   :  { %v1248_v29 = vmul.f32 %v3666_v36, %v1221_v55  ;;  %v1249_v3 = vmul.f32 %v3669_v20, %v1221_v55  ;;  %2704 = vmatprep.subr.bf16.mxu1 %v2777_v0  ;;  %v1250_v21 = vmul.f32 %v3672_v8, %v1225_v45  ;;  %v2780_v36 = vld [vmem:[#allocation14 + $0x18] sm:$0xff]   ;;  %v1252_v61 = vmul.f32 %v3678_v39, %v1229_v47  ;;  %v2781_v20 = vld [vmem:[#allocation12] sm:$0xff]   ;;  %v2783_v8 = vld [vmem:[#allocation12 + $0x8] sm:$0xff]  }
 0x4c8   :  { %2705 = vmatpush3.bf16.msra.mxu1 %v2777_v0  ;;  %2685 = vmatpush3.bf16.msra.mxu0 %v2781_v20  ;;  %v2786_v39 = vld [vmem:[#allocation14 + $0x30] sm:$0xff]   ;;  %v2792_v35 = vld [vmem:[#allocation12 + $0x38] sm:$0xff]   ;;  %v2928_v47 = vld [vmem:[#allocation8 + $0x20] sm:$0xff]  }
 0x4c9   :  { %1331 = vperm.xlu0 %2751, %v1253_v16   ;;  %1261 = vperm.xlu1 %2752, %v1239_v59   ;;  %v2929_v16 = vld [vmem:[#allocation8 + $0x28] sm:$0xff]   ;;  %v2930_v59 = vld [vmem:[#allocation8 + $0x30] sm:$0xff]  }
 0x4ca   :  { %2706 = vmatprep.subr.bf16.mxu1 %v2778_v14  ;;  %2686 = vmatprep.subr.bf16.mxu0 %v4165_v42 }
 0x4cc   :  { %2707 = vmatpush3.bf16.msra.mxu1 %v2778_v14  ;;  %2687 = vmatpush3.bf16.msra.mxu0 %v2783_v8 }
 0x4cd   :  { %1266 = vperm.xlu1 %2752, %v1240_v31   ;;  %2708 = vmatprep.subr.bf16.mxu1 %v2779_v62 }
 0x4ce   :  { %2688 = vmatprep.subr.bf16.mxu0 %v4165_v42 }
 0x4d0   :  { %2709 = vmatpush3.bf16.msra.mxu1 %v2779_v62  ;;  %2689 = vmatpush3.bf16.msra.mxu0 %v2785_v43 }
 0x4d1   :  { %1271 = vperm.xlu1 %2752, %v1241_v27   ;;  %2710 = vmatprep.subr.bf16.mxu1 %v2780_v36 }
 0x4d2   :  { %2690 = vmatprep.subr.bf16.mxu0 %v4165_v42 }
 0x4d4   :  { %2711 = vmatpush3.bf16.msra.mxu1 %v2780_v36  ;;  %2691 = vmatpush3.bf16.msra.mxu0 %v2787_v10 }
 0x4d5   :  { %1276 = vperm.xlu1 %2752, %v1242_v1   ;;  %2712 = vmatprep.subr.bf16.mxu1 %v2782_v51 }
 0x4d6   :  { %2692 = vmatprep.subr.bf16.mxu0 %v4165_v42 }
 0x4d8   :  { %2713 = vmatpush3.bf16.msra.mxu1 %v2782_v51  ;;  %2693 = vmatpush3.bf16.msra.mxu0 %v2789_v50 }
 0x4d9   :  { %1281 = vperm.xlu1 %2752, %v1243_v15   ;;  %2714 = vmatprep.subr.bf16.mxu1 %v2784_v24 }
 0x4da   :  { %2694 = vmatprep.subr.bf16.mxu0 %v4165_v42 }
 0x4dc   :  { %2715 = vmatpush3.bf16.msra.mxu1 %v2784_v24  ;;  %2695 = vmatpush3.bf16.msra.mxu0 %v2790_v9 }
 0x4dd   :  { %1286 = vperm.xlu1 %2752, %v1244_v41   ;;  %2716 = vmatprep.subr.bf16.mxu1 %v2786_v39 }
 0x4de   :  { %2696 = vmatprep.subr.bf16.mxu0 %v4165_v42 }
 0x4e0   :  { %2717 = vmatpush3.bf16.msra.mxu1 %v2786_v39  ;;  %2697 = vmatpush3.bf16.msra.mxu0 %v2791_v12 }
 0x4e1   :  { %1291 = vperm.xlu1 %2752, %v1245_v63   ;;  %2718 = vmatprep.subr.bf16.mxu1 %v2788_v40 }
 0x4e2   :  { %2698 = vmatprep.subr.bf16.mxu0 %v4165_v42 }
 0x4e4   :  { %2719 = vmatpush3.bf16.msra.mxu1 %v2788_v40  ;;  %2699 = vmatpush3.bf16.msra.mxu0 %v2792_v35 }
 0x4e5   :  { %1301 = vperm.xlu1 %2752, %v1247_v44  }
 0x4e7   :  { %2721 = vmatmul.mubr.bf16.vlgmr.msra.gmra.mrb[16].mxu1 %v2925_v54 }
 0x4e8   :  { %2724 = vmatprep.mubr.bf16.mxu1 %v2926_v4 }
 0x4e9   :  { %1306 = vperm.xlu1 %2752, %v1248_v29  }
 0x4ed   :  { %1311 = vperm.xlu1 %2752, %v1249_v3  }
 0x4ef   :  { %2725 = vmatmul.mubr.bf16.gmra.mrb[20].mxu1 %v2927_v32 }
 0x4f0   :  { %2728 = vmatprep.mubr.bf16.mxu1 %v2928_v47 }
 0x4f1   :  { %1316 = vperm.xlu1 %2752, %v1250_v21  }
 0x4f5   :  { %1321 = vperm.xlu1 %2752, %v1251_v49  }
 0x4f7   :  { %2729 = vmatmul.mubr.bf16.gmra.mrb[24].mxu1 %v2929_v16 }
 0x4f8   :  { %2732 = vmatprep.mubr.bf16.mxu1 %v2930_v59 }
 0x4f9   :  { %1326 = vperm.xlu1 %2752, %v1252_v61  }
 0x4ff   :  { %2733 = vmatmul.mubr.bf16.gmra.mrb[28].mxu1 %v2931_v48 }
 0x544   :  { %v1257_v31 = vpop.permute.xlu1 %1256 }
 0x545   :  { %v1334_v5 = vmul.f32 %v1257_v31, %v3385_v56 }
 0x548   :  { %v1262_v27 = vpop.permute.xlu1 %1261 }
 0x549   :  { %v1335_v1 = vmul.f32 %v1262_v27, %v3390_v60 }
 0x54b   :  { %v1350_v15 = vadd.f32 %v1335_v1, %v1334_v5 }
 0x54c   :  { %v1267_v22 = vpop.permute.xlu1 %1266 }
 0x54d   :  { %v1351_v41 = vrot.slane %v1350_v15, 4  ;;  %v1336_v55 = vmul.f32 %v3379_v52, %v1267_v22 }
 0x54f   :  { %v1352_v63 = vadd.f32 %v1351_v41, %v1350_v15 }
 0x550   :  { %v1272_v44 = vpop.permute.xlu1 %1271 }
 0x551   :  { %v1337_v29 = vmul.f32 %v3387_v57, %v1272_v44  ;;  %v1353_v0 = vrot.slane %v1352_v63, 2 }
 0x553   :  { %v1357_v3 = vadd.f32 %v1337_v29, %v1336_v55  ;;  %v1354_v14 = vadd.f32 %v1353_v0, %v1352_v63 }
 0x554   :  { %v1277_v45 = vpop.permute.xlu1 %1276 }
 0x555   :  { %v1358_v21 = vrot.slane %v1357_v3, 4  ;;  %v1338_v56 = vmul.f32 %v1277_v45, %v3403_v11  ;;  %v1355_v61 = vrot.slane %v1354_v14, 1  ;;  %v1297_v11 = vpop.permute.xlu0 %1296 }
 0x556   :  { %v1342_v12 = vmul.f32 %v1297_v11, %v3418_v30 }
 0x557   :  { %v1359_v49 = vadd.f32 %v1358_v21, %v1357_v3  ;;  %v1356_v42 = vadd.f32 %v1355_v61, %v1354_v14 }
 0x558   :  { %v1282_v62 = vpop.permute.xlu1 %1281 }
 0x559   :  { %v1360_v36 = vrot.slane %v1359_v49, 2  ;;  %v1339_v60 = vmul.f32 %v1282_v62, %v3409_v18 }
 0x55b   :  { %v1361_v20 = vadd.f32 %v1360_v36, %v1359_v49  ;;  %v1364_v51 = vadd.f32 %v1339_v60, %v1338_v56  ;;  %v1332_v60 = vpop.permute.xlu0 %1331 }
 0x55c   :  { %v1287_v24 = vpop.permute.xlu1 %1286 }
 0x55d   :  { %v1362_v8 = vrot.slane %v1361_v20, 1  ;;  %v1365_v52 = vrot.slane %v1364_v51, 4  ;;  %v1340_v50 = vmul.f32 %v3398_v6, %v1287_v24 }
 0x55f   :  { %v1363_v57 = vadd.f32 %v1362_v8, %v1361_v20  ;;  %v1366_v43 = vadd.f32 %v1365_v52, %v1364_v51  ;;  %v4166_v51 = vld [vmem:[#allocation26_spill] sm:$0xff] }
 0x560   :  { %v1292_v39 = vpop.permute.xlu1 %1291  ;;  %v1349_v24 = vmul.f32 %v4166_v51, %v1332_v60 }
 0x561   :  { %v1414_v10 = vsel %vm941_vm2, %v1363_v57, %v1356_v42  ;;  %v1367_v40 = vrot.slane %v1366_v43, 2  ;;  %v1341_v54 = vmul.f32 %v3405_v13, %v1292_v39  ;;  %v4167_v42 = vld [vmem:[#allocation25_spill] sm:$0xff] }
 0x563   :  { %v1368_v9 = vadd.f32 %v1367_v40, %v1366_v43  ;;  %v1371_v18 = vadd.f32 %v1341_v54, %v1340_v50 }
 0x564   :  { %v1302_v4 = vpop.permute.xlu1 %1301 }
 0x565   :  { %v1369_v32 = vrot.slane %v1368_v9, 1  ;;  %v1372_v35 = vrot.slane %v1371_v18, 4  ;;  %v1343_v47 = vmul.f32 %v1302_v4, %v3429_v37 }
 0x567   :  { %v1370_v16 = vadd.f32 %v1369_v32, %v1368_v9  ;;  %v1373_v59 = vadd.f32 %v1372_v35, %v1371_v18  ;;  %v1378_v48 = vadd.f32 %v1343_v47, %v1342_v12 }
 0x568   :  { %v1307_v31 = vpop.permute.xlu1 %1306 }
 0x569   :  { %v1415_v27 = vsel %vm943_vm3, %v1370_v16, %v1414_v10  ;;  %v1374_v5 = vrot.slane %v1373_v59, 2  ;;  %v1379_v6 = vrot.slane %v1378_v48, 4  ;;  %v1344_v63 = vmul.f32 %v3414_v25, %v1307_v31  ;;  %v4168_v16 = vld [vmem:[#allocation24_spill] sm:$0xff] }
 0x56b   :  { %v1375_v1 = vadd.f32 %v1374_v5, %v1373_v59  ;;  %v1380_v13 = vadd.f32 %v1379_v6, %v1378_v48 }
 0x56c   :  { %v1312_v15 = vpop.permute.xlu1 %1311 }
 0x56d   :  { %v1376_v22 = vrot.slane %v1375_v1, 1  ;;  %v1381_v41 = vrot.slane %v1380_v13, 2  ;;  %v1345_v30 = vmul.f32 %v3426_v33, %v1312_v15 }
 0x56f   :  { %v1377_v44 = vadd.f32 %v1376_v22, %v1375_v1  ;;  %v1382_v55 = vadd.f32 %v1381_v41, %v1380_v13  ;;  %v1385_v37 = vadd.f32 %v1345_v30, %v1344_v63 }
 0x570   :  { %v1317_v29 = vpop.permute.xlu1 %1316 }
 0x571   :  { %v1416_v0 = vsel %vm945_vm4, %v1377_v44, %v1415_v27  ;;  %v1383_v3 = vrot.slane %v1382_v55, 1  ;;  %v1386_v45 = vrot.slane %v1385_v37, 4  ;;  %v1346_v56 = vmul.f32 %v1317_v29, %v3441_v58 }
 0x573   :  { %v1384_v21 = vadd.f32 %v1383_v3, %v1382_v55  ;;  %v1387_v14 = vadd.f32 %v1386_v45, %v1385_v37  ;;  %v2564_v3 = vld [vmem:[%s4112_s8] ss:$0 sm:$0xff] }
 0x574   :  { %v1322_v49 = vpop.permute.xlu1 %1321 }
 0x575   :  { %v1417_v62 = vsel %vm947_vm5, %v1384_v21, %v1416_v0  ;;  %v1388_v36 = vrot.slane %v1387_v14, 2  ;;  %v1347_v25 = vmul.f32 %v1322_v49, %v3447_v2 }
 0x577   :  { %v1389_v33 = vadd.f32 %v1388_v36, %v1387_v14  ;;  %v1392_v61 = vadd.f32 %v1347_v25, %v1346_v56  ;;  %v4172_v36 = vld [vmem:[#allocation23_spill] sm:$0xff] }
 0x578   :  { %v1327_v20 = vpop.permute.xlu1 %1326 }
 0x579   :  { %v1390_v8 = vrot.slane %v1389_v33, 1  ;;  %v1393_v52 = vrot.slane %v1392_v61, 4  ;;  %v1348_v57 = vmul.f32 %v4167_v42, %v1327_v20 }
 0x57b   :  { %v1391_v43 = vadd.f32 %v1390_v8, %v1389_v33  ;;  %v1394_v39 = vadd.f32 %v1393_v52, %v1392_v61  ;;  %v1399_v10 = vadd.f32 %v1349_v24, %v1348_v57 }
 0x57d   :  { %v1418_v40 = vsel %vm949_vm6, %v1391_v43, %v1417_v62  ;;  %v1395_v50 = vrot.slane %v1394_v39, 2  ;;  %v1400_v54 = vrot.slane %v1399_v10, 4 }
 0x57f   :  { %v1396_v58 = vadd.f32 %v1395_v50, %v1394_v39  ;;  %v1401_v11 = vadd.f32 %v1400_v54, %v1399_v10 }
 0x581   :  { %v1397_v2 = vrot.slane %v1396_v58, 1  ;;  %v1402_v9 = vrot.slane %v1401_v11, 2 }
 0x583   :  { %v1398_v18 = vadd.f32 %v1397_v2, %v1396_v58  ;;  %v1403_v4 = vadd.f32 %v1402_v9, %v1401_v11 }
 0x585   :  { %v1404_v12 = vrot.slane %v1403_v4, 1  ;;  %v1419_v32 = vsel %vm951_vm7, %v1398_v18, %v1418_v40 }
 0x587   :  { %v1405_v35 = vadd.f32 %v1404_v12, %v1403_v4 }
 0x589   :  { %v1420_v47 = vsel %vm953_vm8, %v1405_v35, %v1419_v32 }
 0x58a   :  { %v3768_v59 = vadd.f32 %v1420_v47, %v4168_v16 }
 0x58c   :  { %4169 = vst [vmem:[#allocation26_spill] sm:$0xff] %v3768_v59  ;;  %v1458_v48 = vpack.c.bf16 %v3768_v59, %v3768_v59 }
 0x58e   :  { %2701 = vmatmul.mubr.bf16.vlgmr.msra.gmra.mrb[4].mxu0 %v1458_v48 }
 0x5ba   :  { %v3772_v31 = vpop.f32.mrb[16].mxu1 }
 0x5bb   :  { %v3774_v27 = vpop.f32.mrb[17].mxu1 }
 0x5bc   :  { %v3776_v5 = vpop.f32.mrb[18].mxu1 }
 0x5bd   :  { %v3778_v6 = vpop.f32.mrb[19].mxu1 }
 0x5c2   :  { %v3780_v1 = vpop.f32.mrb[20].mxu1 }
 0x5c3   :  { %v3782_v13 = vpop.f32.mrb[21].mxu1 }
 0x5c4   :  { %v3784_v15 = vpop.f32.mrb[22].mxu1 }
 0x5c5   :  { %v3786_v22 = vpop.f32.mrb[23].mxu1 }
 0x5ca   :  { %v3788_v41 = vpop.f32.mrb[24].mxu1 }
 0x5cb   :  { %v3790_v63 = vpop.f32.mrb[25].mxu1 }
 0x5cc   :  { %v3792_v30 = vpop.f32.mrb[26].mxu1 }
 0x5cd   :  { %v3794_v44 = vpop.f32.mrb[27].mxu1 }
 0x5d2   :  { %v3796_v55 = vpop.f32.mrb[28].mxu1 }
 0x5d3   :  { %4170 = vst [vmem:[#allocation25_spill] sm:$0xff] %v3796_v55  ;;  %v3798_v37 = vpop.f32.mrb[29].mxu1 }
 0x5d4   :  { %v3800_v29 = vpop.f32.mrb[30].mxu1 }
 0x5d5   :  { %4171 = vst [vmem:[#allocation24_spill] sm:$0xff] %v3800_v29  ;;  %v3802_v0 = vpop.f32.mrb[31].mxu1 }
 0x661   :  { %v1547_v45 = vpop.f32.mrb[4].mxu0 }
 0x662   :  { %v1548_v21 = vadd.f32 %v2564_v3, %v1547_v45  ;;  %v2702_v14 = vpop.f32.mrb[5].mxu0 }
 0x663   :  { %v1550_v49 = vpop.f32.mrb[6].mxu0 }
 0x664   :  { %v1699_v62 = vcombine.high %v1548_v21, %v1548_v21  ;;  %v1706_v56 = vrot.slane %v1548_v21, %v4172_v36  ;;  %v2703_v25 = vpop.f32.mrb[7].mxu0 }
 0x666   :  { %v1713_v60 = vrot.slane %v1699_v62, %v4172_v36  ;;  %v1714_v33 = vcombine.high %v1706_v56, %v1706_v56  ;;  %v1722_v61 = vrot.slane %v1706_v56, %v4172_v36  ;;  %v2581_v56 = vld [vmem:[%s4114_s10] ss:$0 sm:$0xff]  ;;  %s2563_s10 = sld [smem:[#allocation15 + $0x1]] }
 0x668   :  { %v1715_v20 = vcombine.high %v1713_v60, %v1713_v60  ;;  %v1736_v51 = vrot.slane %v1714_v33, %v4172_v36  ;;  %v1751_v24 = vrot.slane %v1722_v61, %v3329_v17  ;;  %v1744_v8 = vcombine.high %v1722_v61, %v1722_v61 }
 0x669   :  { %v1729_v52 = vrot.slane %v1713_v60, %v4172_v36 }
 0x66a   :  { %v1755_v42 = vrot.slane %v1736_v51, %v3329_v17  ;;  %v1788_v57 = vadd.f32 %v1751_v24, %v3774_v27  ;;  %v1789_v43 = vadd.f32 %v1751_v24, %v3778_v6  ;;  %v1746_v39 = vcombine.high %v1736_v51, %v1736_v51 }
 0x66b   :  { %v1759_v10 = vrot.slane %v1744_v8, %v3329_v17  ;;  %v1743_v40 = vrot.slane %v1715_v20, %v4172_v36  ;;  %v1767_v50 = vrot.slane %v1729_v52, %v3329_v17  ;;  %v1745_v54 = vcombine.high %v1729_v52, %v1729_v52 }
 0x66c   :  { %v1790_v58 = vadd.f32 %v3772_v31, %v1755_v42  ;;  %v1791_v11 = vadd.f32 %v3776_v5, %v1755_v42  ;;  %2859 = vtanh.f32 %v1788_v57  ;;  %v1763_v2 = vrot.slane %v1746_v39, %v3329_v17 }
 0x66d   :  { %2861 = vtanh.f32 %v1789_v43  ;;  %v1792_v9 = vadd.f32 %v1759_v10, %v3782_v13  ;;  %v1793_v18 = vadd.f32 %v1759_v10, %v3786_v22  ;;  %v1771_v4 = vrot.slane %v1743_v40, %v3329_v17 }
 0x66e   :  { %v1794_v12 = vadd.f32 %v3780_v1, %v1763_v2  ;;  %v1795_v32 = vadd.f32 %v3784_v15, %v1763_v2  ;;  %v1796_v35 = vadd.f32 %v1767_v50, %v3790_v63  ;;  %2863 = vtanh.f32 %v1790_v58 }
 0x66f   :  { %v1798_v47 = vadd.f32 %v3788_v41, %v1771_v4  ;;  %v1799_v16 = vadd.f32 %v3792_v30, %v1771_v4  ;;  %v1797_v48 = vadd.f32 %v1767_v50, %v3794_v44  ;;  %v1747_v3 = vcombine.high %v1743_v40, %v1743_v40 }
 0x670   :  { %v1775_v45 = vrot.slane %v1745_v54, %v3329_v17  ;;  %2865 = vtanh.f32 %v1792_v9 }
 0x671   :  { %v1779_v21 = vrot.slane %v1747_v3, %v3329_v17  ;;  %2867 = vtanh.f32 %v1791_v11 }
 0x672   :  { %v1800_v14 = vadd.f32 %v1775_v45, %v3798_v37  ;;  %v1801_v49 = vadd.f32 %v1775_v45, %v3802_v0  ;;  %2869 = vtanh.f32 %v1796_v35 }
 0x673   :  { %v1802_v62 = vadd.f32 %v3796_v55, %v1779_v21  ;;  %v1803_v36 = vadd.f32 %v3800_v29, %v1779_v21  ;;  %2871 = vtanh.f32 %v1794_v12 }
 0x674   :  { %2873 = vtanh.f32 %v1793_v18 }
 0x675   :  { %2875 = vtanh.f32 %v1798_v47 }
 0x676   :  { %v2860_v25 = vpop.eup %2859  ;;  %2877 = vtanh.f32 %v1797_v48 }
 0x677   :  { %v2862_v60 = vpop.eup %2861  ;;  %v1826_v33 = vmul.f32 %v2860_v25, %v2581_v56  ;;  %2879 = vtanh.f32 %v1795_v32 }
 0x678   :  { %v1827_v61 = vmul.f32 %v2862_v60, %v2581_v56  ;;  %v2864_v20 = vpop.eup %2863  ;;  %2881 = vtanh.f32 %v1800_v14  ;;  %v1874_v14 = vstv %s2563_s10  ;;  %v4173_v60 = vld [vmem:[#allocation29_spill] sm:$0xff] }
 0x679   :  { %1842 = vadd.xlane.f32.xlu1 %v1826_v33  ;;  %v1828_v8 = vmul.f32 %v2864_v20, %v2581_v56  ;;  %2883 = vtanh.f32 %v1799_v16 }
 0x67a   :  { %1844 = vadd.xlane.f32.xlu0 %v1827_v61  ;;  %v2866_v51 = vpop.eup %2865  ;;  %2885 = vtanh.f32 %v1802_v62  ;;  %v4174_v61 = vld [vmem:[#allocation27_spill] sm:$0xff] }
 0x67b   :  { %v1830_v24 = vmul.f32 %v2866_v51, %v2581_v56  ;;  %v2868_v52 = vpop.eup %2867  ;;  %2887 = vtanh.f32 %v1801_v49 }
 0x67c   :  { %v2870_v42 = vpop.eup %2869  ;;  %v1829_v43 = vmul.f32 %v2868_v52, %v2581_v56  ;;  %2889 = vtanh.f32 %v1803_v36 }
 0x67d   :  { %1850 = vadd.xlane.f32.xlu1 %v1830_v24  ;;  %v2872_v57 = vpop.eup %2871  ;;  %v1834_v39 = vmul.f32 %v2870_v42, %v2581_v56 }
 0x67e   :  { %1846 = vadd.xlane.f32.xlu0 %v1828_v8  ;;  %v2874_v10 = vpop.eup %2873  ;;  %v1832_v54 = vmul.f32 %v2872_v57, %v2581_v56 }
 0x67f   :  { %v2876_v40 = vpop.eup %2875  ;;  %v1831_v50 = vmul.f32 %v2874_v10, %v2581_v56  ;;  %v4176_v10 = vld [vmem:[#allocation30_spill] sm:$0xff] }
 0x680   :  { %v2878_v58 = vpop.eup %2877  ;;  %v1836_v9 = vmul.f32 %v2876_v40, %v2581_v56 }
 0x681   :  { %1858 = vadd.xlane.f32.xlu1 %v1834_v39  ;;  %v2880_v11 = vpop.eup %2879  ;;  %v1835_v2 = vmul.f32 %v2878_v58, %v2581_v56 }
 0x682   :  { %1848 = vadd.xlane.f32.xlu0 %v1829_v43  ;;  %v2882_v18 = vpop.eup %2881  ;;  %v1833_v12 = vmul.f32 %v2880_v11, %v2581_v56  ;;  %v4177_v11 = vld [vmem:[#allocation31_spill] sm:$0xff] }
 0x683   :  { %v2884_v4 = vpop.eup %2883  ;;  %v1838_v32 = vmul.f32 %v2882_v18, %v2581_v56  ;;  %v4178_v18 = vld [vmem:[#allocation32_spill] sm:$0xff] }
 0x684   :  { %v2886_v35 = vpop.eup %2885  ;;  %v1837_v47 = vmul.f32 %v2884_v4, %v2581_v56 }
 0x685   :  { %1854 = vadd.xlane.f32.xlu1 %v1832_v54  ;;  %v1840_v16 = vmul.f32 %v2886_v35, %v2581_v56  ;;  %v2888_v48 = vpop.eup %2887 }
 0x686   :  { %1852 = vadd.xlane.f32.xlu0 %v1831_v50  ;;  %v1839_v3 = vmul.f32 %v2888_v48, %v2581_v56  ;;  %v2890_v45 = vpop.eup %2889 }
 0x687   :  { %v1841_v21 = vmul.f32 %v2890_v45, %v2581_v56  ;;  %v4175_v56 = vld [vmem:[#allocation28_spill] sm:$0xff] }
 0x689   :  { %1862 = vadd.xlane.f32.xlu1 %v1836_v9 }
 0x68a   :  { %1860 = vadd.xlane.f32.xlu0 %v1835_v2 }
 0x68d   :  { %1866 = vadd.xlane.f32.xlu1 %v1838_v32 }
 0x68e   :  { %1856 = vadd.xlane.f32.xlu0 %v1833_v12 }
 0x691   :  { %1870 = vadd.xlane.f32.xlu1 %v1840_v16 }
 0x692   :  { %1864 = vadd.xlane.f32.xlu0 %v1837_v47  ;;  %v4179_v47 = vld [vmem:[#allocation35_spill] sm:$0xff] }
 0x696   :  { %1868 = vadd.xlane.f32.xlu0 %v1839_v3  ;;  %v4180_v3 = vld [vmem:[#allocation36_spill] sm:$0xff] }
 0x69a   :  { %1872 = vadd.xlane.f32.xlu0 %v1841_v21 }
 0x706   :  { %v1843_v49 = vpop.xlane.xlu1 %1842 }
 0x707   :  { %v1845_v62 = vpop.xlane.xlu0 %1844  ;;  %v1875_v36 = vadd.f32 %v1874_v14, %v1843_v49 }
 0x708   :  { %v1876_v25 = vadd.f32 %v1874_v14, %v1845_v62 }
 0x709   :  { %v3841_v33 = vadd.f32 %v1875_v36, %v4173_v60  ;;  %v4181_v36 = vld [vmem:[#allocation33_spill] sm:$0xff] }
 0x70a   :  { %v3844_v20 = vadd.f32 %v1876_v25, %v4174_v61  ;;  %v1851_v51 = vpop.xlane.xlu1 %1850  ;;  %v4182_v61 = vld [vmem:[#allocation34_spill] sm:$0xff] }
 0x70b   :  { %v1847_v24 = vpop.xlane.xlu0 %1846  ;;  %1924 = vperm.xlu1 %2752, %v3841_v33   ;;  %v1879_v39 = vadd.f32 %v1874_v14, %v1851_v51 }
 0x70c   :  { %v1877_v8 = vadd.f32 %v1874_v14, %v1847_v24  ;;  %1927 = vperm.xlu0 %2751, %v3844_v20  }
 0x70d   :  { %v3857_v2 = vadd.f32 %v1879_v39, %v4177_v11 }
 0x70e   :  { %v3849_v52 = vadd.f32 %v1877_v8, %v4175_v56  ;;  %v1859_v57 = vpop.xlane.xlu1 %1858  ;;  %v4183_v56 = vld [vmem:[#allocation37_spill] sm:$0xff] }
 0x70f   :  { %v1849_v42 = vpop.xlane.xlu0 %1848  ;;  %v1883_v9 = vadd.f32 %v1874_v14, %v1859_v57 }
 0x710   :  { %v1878_v43 = vadd.f32 %v1874_v14, %v1849_v42  ;;  %1930 = vperm.xlu1 %2752, %v3849_v52  }
 0x711   :  { %v3865_v16 = vadd.f32 %v1883_v9, %v4179_v47  ;;  %v4187_v47 = vld [vmem:[#allocation41_spill] sm:$0xff] }
 0x712   :  { %v3853_v40 = vadd.f32 %v1878_v43, %v4176_v10  ;;  %v1855_v54 = vpop.xlane.xlu1 %1854  ;;  %v4184_v43 = vld [vmem:[#allocation38_spill] sm:$0xff] }
 0x713   :  { %v1853_v50 = vpop.xlane.xlu0 %1852  ;;  %v1881_v48 = vadd.f32 %v1874_v14, %v1855_v54 }
 0x714   :  { %v1880_v58 = vadd.f32 %v1874_v14, %v1853_v50  ;;  %1933 = vperm.xlu1 %2752, %v3853_v40  }
 0x715   :  { %v3873_v25 = vadd.f32 %v1881_v48, %v4181_v36 }
 0x716   :  { %v3860_v4 = vadd.f32 %v1880_v58, %v4178_v18  ;;  %v1863_v32 = vpop.xlane.xlu1 %1862  ;;  %v4185_v58 = vld [vmem:[#allocation39_spill] sm:$0xff]  ;;  %v4186_v18 = vld [vmem:[#allocation40_spill] sm:$0xff] }
 0x717   :  { %v1861_v12 = vpop.xlane.xlu0 %1860  ;;  %v1885_v60 = vadd.f32 %v1874_v14, %v1863_v32 }
 0x718   :  { %v1884_v35 = vadd.f32 %v1874_v14, %v1861_v12  ;;  %1939 = vperm.xlu0 %2751, %v3860_v4   ;;  %1936 = vperm.xlu1 %2752, %v3857_v2  }
 0x719   :  { %v3881_v42 = vadd.f32 %v1885_v60, %v4183_v56 }
 0x71a   :  { %v3868_v45 = vadd.f32 %v1884_v35, %v4180_v3  ;;  %v1867_v62 = vpop.xlane.xlu1 %1866  ;;  %v4188_v3 = vld [vmem:[#allocation42_spill] sm:$0xff] }
 0x71b   :  { %v1857_v21 = vpop.xlane.xlu0 %1856  ;;  %v1887_v57 = vadd.f32 %v1874_v14, %v1867_v62 }
 0x71c   :  { %v1882_v49 = vadd.f32 %v1874_v14, %v1857_v21  ;;  %1951 = vperm.xlu0 %2751, %v3868_v45   ;;  %1948 = vperm.xlu1 %2752, %v3865_v16  }
 0x71d   :  { %v3889_v11 = vadd.f32 %v1887_v57, %v4185_v58 }
 0x71e   :  { %v3876_v51 = vadd.f32 %v1882_v49, %v4182_v61  ;;  %v1871_v10 = vpop.xlane.xlu1 %1870 }
 0x71f   :  { %v1865_v24 = vpop.xlane.xlu0 %1864  ;;  %v1889_v9 = vadd.f32 %v1874_v14, %v1871_v10 }
 0x720   :  { %v1886_v8 = vadd.f32 %v1874_v14, %v1865_v24  ;;  %1945 = vperm.xlu0 %2751, %v3876_v51   ;;  %1942 = vperm.xlu1 %2752, %v3873_v25  }
 0x721   :  { %v3897_v48 = vadd.f32 %v1889_v9, %v4187_v47 }
 0x722   :  { %v3884_v39 = vadd.f32 %v1886_v8, %v4184_v43 }
 0x723   :  { %v1869_v50 = vpop.xlane.xlu0 %1868 }
 0x724   :  { %v1888_v54 = vadd.f32 %v1874_v14, %v1869_v50  ;;  %1957 = vperm.xlu0 %2751, %v3884_v39   ;;  %1954 = vperm.xlu1 %2752, %v3881_v42  }
 0x726   :  { %v3892_v12 = vadd.f32 %v1888_v54, %v4186_v18 }
 0x727   :  { %v1873_v32 = vpop.xlane.xlu0 %1872 }
 0x728   :  { %v1890_v35 = vadd.f32 %v1874_v14, %v1873_v32  ;;  %1963 = vperm.xlu0 %2751, %v3892_v12   ;;  %1960 = vperm.xlu1 %2752, %v3889_v11  }
 0x72a   :  { %v3900_v21 = vadd.f32 %v1890_v35, %v4188_v3 }
 0x72c   :  { %1969 = vperm.xlu0 %2751, %v3900_v21   ;;  %1966 = vperm.xlu1 %2752, %v3897_v48  }
 0x78a   :  { %v1925_v49 = vpop.permute.xlu1 %1924 }
 0x78b   :  { %v1928_v36 = vpop.permute.xlu0 %1927  ;;  %v1974_v10 = vrot.slane %v1925_v49, %v3568_v7 }
 0x78c   :  { %v1978_v58 = vrot.slane %v1928_v36, %v3571_v46 }
 0x78e   :  { %v1979_v49 = vsel %vm876_vm1, %v1978_v58, %v1974_v10 }
 0x78f   :  { %v1931_v62 = vpop.permute.xlu1 %1930 }
 0x790   :  { %v1983_v9 = vrot.slane %v1931_v62, %v3568_v7 }
 0x793   :  { %v1934_v60 = vpop.permute.xlu1 %1933 }
 0x794   :  { %v1987_v43 = vrot.slane %v1934_v60, %v3571_v46 }
 0x796   :  { %v1988_v3 = vsel %vm876_vm1, %v1987_v43, %v1983_v9 }
 0x797   :  { %v1940_v61 = vpop.permute.xlu0 %1939  ;;  %v1937_v14 = vpop.permute.xlu1 %1936  ;;  %v2043_v62 = vsel %vm941_vm2, %v1988_v3, %v1979_v49 }
 0x798   :  { %v1996_v50 = vrot.slane %v1940_v61, %v3571_v46  ;;  %v1992_v54 = vrot.slane %v1937_v14, %v3568_v7 }
 0x79a   :  { %v1997_v60 = vsel %vm876_vm1, %v1996_v50, %v1992_v54 }
 0x79b   :  { %v1952_v24 = vpop.permute.xlu0 %1951  ;;  %v1949_v8 = vpop.permute.xlu1 %1948  ;;  %v2044_v43 = vsel %vm943_vm3, %v1997_v60, %v2043_v62 }
 0x79f   :  { %v1946_v56 = vpop.permute.xlu0 %1945  ;;  %v1943_v57 = vpop.permute.xlu1 %1942 }
 0x7a0   :  { %v2005_v18 = vrot.slane %v1946_v56, %v3571_v46  ;;  %v2001_v32 = vrot.slane %v1943_v57, %v3568_v7  ;;  %v2014_v56 = vrot.slane %v1952_v24, %v3571_v46  ;;  %v2010_v57 = vrot.slane %v1949_v8, %v3568_v7 }
 0x7a2   :  { %v2006_v61 = vsel %vm876_vm1, %v2005_v18, %v2001_v32  ;;  %v2015_v9 = vsel %vm876_vm1, %v2014_v56, %v2010_v57 }
 0x7a3   :  { %v1958_v35 = vpop.permute.xlu0 %1957  ;;  %v1955_v47 = vpop.permute.xlu1 %1954  ;;  %v2045_v54 = vsel %vm945_vm4, %v2006_v61, %v2044_v43 }
 0x7a4   :  { %v2023_v14 = vrot.slane %v1958_v35, %v3571_v46  ;;  %v2019_v36 = vrot.slane %v1955_v47, %v3568_v7  ;;  %v2046_v47 = vsel %vm947_vm5, %v2015_v9, %v2045_v54 }
 0x7a6   :  { %v2024_v58 = vsel %vm876_vm1, %v2023_v14, %v2019_v36 }
 0x7a7   :  { %v1964_v59 = vpop.permute.xlu0 %1963  ;;  %v1961_v55 = vpop.permute.xlu1 %1960 }
 0x7a8   :  { %v2032_v50 = vrot.slane %v1964_v59, %v3571_v46  ;;  %v2028_v10 = vrot.slane %v1961_v55, %v3568_v7  ;;  %v2047_v59 = vsel %vm949_vm6, %v2024_v58, %v2046_v47 }
 0x7aa   :  { %v2033_v18 = vsel %vm876_vm1, %v2032_v50, %v2028_v10 }
 0x7ab   :  { %v1970_v32 = vpop.permute.xlu0 %1969  ;;  %v1967_v24 = vpop.permute.xlu1 %1966  ;;  %v2048_v3 = vsel %vm951_vm7, %v2033_v18, %v2047_v59 }
 0x7ac   :  { %v2041_v8 = vrot.slane %v1970_v32, %v3571_v46  ;;  %v2037_v35 = vrot.slane %v1967_v24, %v3568_v7 }
 0x7ae   :  { %v2042_v55 = vsel %vm876_vm1, %v2041_v8, %v2037_v35 }
 0x7af   :  { %v2049_v60 = vsel %vm953_vm8, %v2042_v55, %v2048_v3 }
 0x7b0   :  { %v2051_v49 = vsel %vm956_vm9, %v2049_v60, -inf }
 0x7b1   :  { %2052 = vmax.xlane.f32.xlu1 %v2051_v49 }
 0x83e   :  { %v2053_v61 = vpop.xlane.xlu1 %2052 }
 0x83f   :  { %v2058_v14 = vrot.slane %v2053_v61, %v3329_v17  ;;  %v2062_v62 = vrot.slane %v2053_v61, %v3333_v19  ;;  %v2074_v57 = vrot.slane %v2053_v61, %v3349_v28  ;;  %v3944_v58 = vrot.slane %v2053_v61, %v3466_v53 }
 0x840   :  { %v2066_v9 = vrot.slane %v2053_v61, %v3338_v23  ;;  %v2070_v35 = vrot.slane %v2053_v61, %v3346_v26 }
 0x841   :  { %v2095_v36 = vsub.f32 %v3841_v33, %v2058_v14  ;;  %v2096_v56 = vsub.f32 %v3844_v20, %v2058_v14  ;;  %v2097_v50 = vsub.f32 %v3849_v52, %v2062_v62  ;;  %v2104_v54 = vsub.f32 %v3868_v45, %v2074_v57 }
 0x842   :  { %v2098_v33 = vsub.f32 %v3853_v40, %v2062_v62  ;;  %v2110_v20 = vsub.f32 %v3900_v21, %v3944_v58  ;;  %v2099_v24 = vsub.f32 %v3857_v2, %v2066_v9  ;;  %v2100_v40 = vsub.f32 %v3860_v4, %v2066_v9 }
 0x843   :  { %v2111_v43 = vmul.f32 1.442695, %v2095_v36  ;;  %v2113_v10 = vmul.f32 1.442695, %v2096_v56  ;;  %v2115_v18 = vmul.f32 1.442695, %v2097_v50  ;;  %v2101_v2 = vsub.f32 %v3873_v25, %v2070_v35 }
 0x844   :  { %v2129_v32 = vmul.f32 1.442695, %v2104_v54  ;;  %v2117_v52 = vmul.f32 1.442695, %v2098_v33  ;;  %v2141_v45 = vmul.f32 1.442695, %v2110_v20  ;;  %v2102_v60 = vsub.f32 %v3876_v51, %v2070_v35 }
 0x845   :  { %2891 = vpow2.f32 %v2111_v43  ;;  %v2119_v47 = vmul.f32 1.442695, %v2099_v24  ;;  %v2121_v21 = vmul.f32 1.442695, %v2100_v40  ;;  %v2123_v4 = vmul.f32 1.442695, %v2101_v2 }
 0x846   :  { %2893 = vpow2.f32 %v2113_v10  ;;  %v2078_v25 = vrot.slane %v2053_v61, %v3361_v34  ;;  %v2103_v14 = vsub.f32 %v3865_v16, %v2074_v57  ;;  %v2125_v36 = vmul.f32 1.442695, %v2102_v60 }
 0x847   :  { %2895 = vpow2.f32 %v2115_v18  ;;  %v2082_v16 = vrot.slane %v2053_v61, %v3366_v38 }
 0x848   :  { %2897 = vpow2.f32 %v2129_v32  ;;  %v2105_v51 = vsub.f32 %v3881_v42, %v2078_v25  ;;  %v2127_v43 = vmul.f32 1.442695, %v2103_v14  ;;  %v2106_v57 = vsub.f32 %v3884_v39, %v2078_v25 }
 0x849   :  { %2899 = vpow2.f32 %v2117_v52  ;;  %v2107_v9 = vsub.f32 %v3889_v11, %v2082_v16  ;;  %v2108_v18 = vsub.f32 %v3892_v12, %v2082_v16  ;;  %v2109_v39 = vsub.f32 %v3897_v48, %v3944_v58 }
 0x84a   :  { %2901 = vpow2.f32 %v2141_v45  ;;  %v2131_v10 = vmul.f32 1.442695, %v2105_v51  ;;  %v2133_v42 = vmul.f32 1.442695, %v2106_v57 }
 0x84b   :  { %2903 = vpow2.f32 %v2119_v47  ;;  %v2135_v61 = vmul.f32 1.442695, %v2107_v9  ;;  %v2137_v20 = vmul.f32 1.442695, %v2108_v18  ;;  %v2139_v24 = vmul.f32 1.442695, %v2109_v39 }
 0x84c   :  { %2905 = vpow2.f32 %v2121_v21 }
 0x84d   :  { %2907 = vpow2.f32 %v2123_v4 }
 0x84e   :  { %2909 = vpow2.f32 %v2125_v36 }
 0x84f   :  { %v3951_v8 = vpop.eup %2891  ;;  %2911 = vpow2.f32 %v2127_v43 }
 0x850   :  { %2160 = vperm.xlu0 %2751, %v3951_v8   ;;  %v3956_v59 = vpop.eup %2893  ;;  %2913 = vpow2.f32 %v2131_v10 }
 0x851   :  { %v3960_v55 = vpop.eup %2895  ;;  %2915 = vpow2.f32 %v2133_v42 }
 0x852   :  { %v3962_v3 = vpop.eup %2897  ;;  %2917 = vpow2.f32 %v2135_v61 }
 0x853   :  { %2187 = vperm.xlu1 %2752, %v3962_v3   ;;  %v3967_v49 = vpop.eup %2899  ;;  %2919 = vpow2.f32 %v2137_v20 }
 0x854   :  { %2163 = vperm.xlu0 %2751, %v3956_v59   ;;  %v3972_v62 = vpop.eup %2901  ;;  %2921 = vpow2.f32 %v2139_v24 }
 0x855   :  { %v3974_v56 = vpop.eup %2903 }
 0x856   :  { %v3979_v50 = vpop.eup %2905 }
 0x857   :  { %2205 = vperm.xlu1 %2752, %v3972_v62   ;;  %v3984_v54 = vpop.eup %2907 }
 0x858   :  { %2166 = vperm.xlu0 %2751, %v3960_v55   ;;  %v3988_v33 = vpop.eup %2909 }
 0x859   :  { %v3992_v32 = vpop.eup %2911 }
 0x85a   :  { %v3997_v11 = vpop.eup %2913 }
 0x85b   :  { %v4000_v52 = vpop.eup %2915 }
 0x85c   :  { %2169 = vperm.xlu0 %2751, %v3967_v49   ;;  %v4003_v12 = vpop.eup %2917 }
 0x85d   :  { %v4006_v45 = vpop.eup %2919 }
 0x85e   :  { %v4009_v48 = vpop.eup %2921 }
 0x860   :  { %2172 = vperm.xlu0 %2751, %v3974_v56  }
 0x864   :  { %2175 = vperm.xlu0 %2751, %v3979_v50  }
 0x868   :  { %2178 = vperm.xlu0 %2751, %v3984_v54  }
 0x86c   :  { %2181 = vperm.xlu0 %2751, %v3988_v33  }
 0x870   :  { %2184 = vperm.xlu0 %2751, %v3992_v32  }
 0x874   :  { %2190 = vperm.xlu0 %2751, %v3997_v11  }
 0x878   :  { %2193 = vperm.xlu0 %2751, %v4000_v52  }
 0x87c   :  { %2196 = vperm.xlu0 %2751, %v4003_v12  }
 0x880   :  { %2199 = vperm.xlu0 %2751, %v4006_v45  }
 0x884   :  { %2202 = vperm.xlu0 %2751, %v4009_v48  }
 0x8cf   :  { %v2161_v58 = vpop.permute.xlu0 %2160 }
 0x8d0   :  { %v2210_v39 = vrot.slane %v2161_v58, %v3568_v7 }
 0x8d2   :  { %v2188_v43 = vpop.permute.xlu1 %2187 }
 0x8d3   :  { %v2164_v35 = vpop.permute.xlu0 %2163 }
 0x8d4   :  { %v2214_v10 = vrot.slane %v2164_v35, %v3571_v46 }
 0x8d6   :  { %v2206_v58 = vpop.permute.xlu1 %2205 }
 0x8d7   :  { %v2167_v40 = vpop.permute.xlu0 %2166 }
 0x8d8   :  { %v2219_v9 = vrot.slane %v2167_v40, %v3568_v7  ;;  %v2215_v40 = vsel %vm876_vm1, %v2214_v10, %v2210_v39 }
 0x8db   :  { %v2170_v47 = vpop.permute.xlu0 %2169 }
 0x8dc   :  { %v2223_v51 = vrot.slane %v2170_v47, %v3571_v46 }
 0x8de   :  { %v2224_v20 = vsel %vm876_vm1, %v2223_v51, %v2219_v9 }
 0x8df   :  { %v2173_v2 = vpop.permute.xlu0 %2172  ;;  %v2279_v51 = vsel %vm941_vm2, %v2224_v20, %v2215_v40 }
 0x8e0   :  { %v2228_v18 = vrot.slane %v2173_v2, %v3568_v7 }
 0x8e3   :  { %v2176_v21 = vpop.permute.xlu0 %2175 }
 0x8e4   :  { %v2232_v16 = vrot.slane %v2176_v21, %v3571_v46  ;;  %v2250_v21 = vrot.slane %v2188_v43, %v3571_v46 }
 0x8e6   :  { %v2233_v35 = vsel %vm876_vm1, %v2232_v16, %v2228_v18 }
 0x8e7   :  { %v2179_v60 = vpop.permute.xlu0 %2178  ;;  %v2280_v43 = vsel %vm943_vm3, %v2233_v35, %v2279_v51 }
 0x8e8   :  { %v2237_v24 = vrot.slane %v2179_v60, %v3568_v7 }
 0x8eb   :  { %v2182_v4 = vpop.permute.xlu0 %2181 }
 0x8ec   :  { %v2241_v42 = vrot.slane %v2182_v4, %v3571_v46 }
 0x8ee   :  { %v2242_v4 = vsel %vm876_vm1, %v2241_v42, %v2237_v24 }
 0x8ef   :  { %v2185_v25 = vpop.permute.xlu0 %2184  ;;  %v2281_v9 = vsel %vm945_vm4, %v2242_v4, %v2280_v43 }
 0x8f0   :  { %v2246_v61 = vrot.slane %v2185_v25, %v3568_v7 }
 0x8f2   :  { %v2251_v60 = vsel %vm876_vm1, %v2250_v21, %v2246_v61 }
 0x8f3   :  { %v2191_v14 = vpop.permute.xlu0 %2190 }
 0x8f4   :  { %v2255_v2 = vrot.slane %v2191_v14, %v3568_v7  ;;  %v2277_v14 = vrot.slane %v2206_v58, %v3571_v46 }
 0x8f7   :  { %v2194_v36 = vpop.permute.xlu0 %2193 }
 0x8f8   :  { %v2259_v47 = vrot.slane %v2194_v36, %v3571_v46 }
 0x8fa   :  { %v2260_v16 = vsel %vm876_vm1, %v2259_v47, %v2255_v2 }
 0x8fb   :  { %v2197_v57 = vpop.permute.xlu0 %2196 }
 0x8fc   :  { %v2264_v36 = vrot.slane %v2197_v57, %v3568_v7 }
 0x8ff   :  { %v2200_v29 = vpop.permute.xlu0 %2199 }
 0x900   :  { %v2268_v25 = vrot.slane %v2200_v29, %v3571_v46  ;;  %v2282_v29 = vsel %vm947_vm5, %v2251_v60, %v2281_v9 }
 0x901   :  { %v2283_v39 = vsel %vm949_vm6, %v2260_v16, %v2282_v29 }
 0x902   :  { %v2269_v10 = vsel %vm876_vm1, %v2268_v25, %v2264_v36 }
 0x903   :  { %v2203_v42 = vpop.permute.xlu0 %2202  ;;  %v2284_v57 = vsel %vm951_vm7, %v2269_v10, %v2283_v39 }
 0x904   :  { %v2273_v18 = vrot.slane %v2203_v42, %v3568_v7 }
 0x906   :  { %v2278_v61 = vsel %vm876_vm1, %v2277_v14, %v2273_v18 }
 0x907   :  { %v2285_v20 = vsel %vm953_vm8, %v2278_v61, %v2284_v57 }
 0x908   :  { %v2287_v24 = vsel %vm956_vm9, %v2285_v20, 0.0 }
 0x909   :  { %2288 = vadd.xlane.f32.xlu0 %v2287_v24 }
 0x996   :  { %v2289_v47 = vpop.xlane.xlu0 %2288 }
 0x997   :  { %2923 = vrcp.f32 %v2289_v47 }
 0x9a1   :  { %v2924_v21 = vpop.eup %2923 }
 0x9a2   :  { %v2311_v46 = vrot.slane %v2924_v21, %v3349_v28  ;;  %v2295_v35 = vrot.slane %v2924_v21, %v3329_v17  ;;  %v2323_v4 = vrot.slane %v2924_v21, %v3466_v53  ;;  %v2299_v58 = vrot.slane %v2924_v21, %v3333_v19 }
 0x9a4   :  { %v2340_v7 = vmul.f32 %v3992_v32, %v2311_v46  ;;  %v2332_v40 = vmul.f32 %v3951_v8, %v2295_v35  ;;  %v2347_v2 = vmul.f32 %v3972_v62, %v2323_v4  ;;  %v2333_v25 = vmul.f32 %v3956_v59, %v2295_v35 }
 0x9a5   :  { %v2334_v28 = vmul.f32 %v3960_v55, %v2299_v58  ;;  %v2335_v17 = vmul.f32 %v3967_v49, %v2299_v58  ;;  %v2303_v32 = vrot.slane %v2924_v21, %v3338_v23  ;;  %v2307_v62 = vrot.slane %v2924_v21, %v3346_v26 }
 0x9a6   :  { %2390 = vperm.xlu0 %2751, %v2340_v7   ;;  %2350 = vperm.xlu1 %2752, %v2332_v40   ;;  %v2341_v55 = vmul.f32 %v3962_v3, %v2311_v46  ;;  %v2315_v49 = vrot.slane %v2924_v21, %v3361_v34 }
 0x9a7   :  { %v2336_v53 = vmul.f32 %v3974_v56, %v2303_v32  ;;  %v2337_v8 = vmul.f32 %v3979_v50, %v2303_v32  ;;  %v2338_v19 = vmul.f32 %v3984_v54, %v2307_v62  ;;  %v2339_v59 = vmul.f32 %v3988_v33, %v2307_v62 }
 0x9a8   :  { %v2342_v23 = vmul.f32 %v3997_v11, %v2315_v49  ;;  %v2343_v56 = vmul.f32 %v4000_v52, %v2315_v49  ;;  %v2319_v50 = vrot.slane %v2924_v21, %v3366_v38  ;;  %v2346_v33 = vmul.f32 %v4009_v48, %v2323_v4 }
 0x9aa   :  { %2425 = vperm.xlu0 %2751, %v2347_v2   ;;  %2355 = vperm.xlu1 %2752, %v2333_v25   ;;  %v2344_v26 = vmul.f32 %v4003_v12, %v2319_v50  ;;  %v2345_v54 = vmul.f32 %v4006_v45, %v2319_v50 }
 0x9ae   :  { %2360 = vperm.xlu1 %2752, %v2334_v28  }
 0x9b2   :  { %2365 = vperm.xlu1 %2752, %v2335_v17  }
 0x9b6   :  { %2370 = vperm.xlu1 %2752, %v2336_v53  }
 0x9ba   :  { %2375 = vperm.xlu1 %2752, %v2337_v8  }
 0x9be   :  { %2380 = vperm.xlu1 %2752, %v2338_v19  }
 0x9c2   :  { %2385 = vperm.xlu1 %2752, %v2339_v59  }
 0x9c6   :  { %2395 = vperm.xlu1 %2752, %v2341_v55  }
 0x9ca   :  { %2400 = vperm.xlu1 %2752, %v2342_v23  }
 0x9ce   :  { %2405 = vperm.xlu1 %2752, %v2343_v56  }
 0x9d2   :  { %2410 = vperm.xlu1 %2752, %v2344_v26  }
 0x9d6   :  { %2415 = vperm.xlu1 %2752, %v2345_v54  }
 0x9da   :  { %2420 = vperm.xlu1 %2752, %v2346_v33  }
 0xa25   :  { %v2351_v3 = vpop.permute.xlu1 %2350 }
 0xa26   :  { %v2428_v51 = vmul.f32 %v2351_v3, %v3774_v27 }
 0xa29   :  { %v2356_v34 = vpop.permute.xlu1 %2355 }
 0xa2a   :  { %v2429_v11 = vmul.f32 %v2356_v34, %v3778_v6 }
 0xa2c   :  { %v2444_v60 = vadd.f32 %v2429_v11, %v2428_v51 }
 0xa2d   :  { %v2361_v52 = vpop.permute.xlu1 %2360 }
 0xa2e   :  { %v2445_v36 = vrot.slane %v2444_v60, 4  ;;  %v2430_v12 = vmul.f32 %v3772_v31, %v2361_v52 }
 0xa30   :  { %v2446_v38 = vadd.f32 %v2445_v36, %v2444_v60 }
 0xa31   :  { %v2366_v43 = vpop.permute.xlu1 %2365 }
 0xa32   :  { %v2431_v16 = vmul.f32 %v3776_v5, %v2366_v43  ;;  %v2447_v45 = vrot.slane %v2446_v38, 2 }
 0xa34   :  { %v2451_v9 = vadd.f32 %v2431_v16, %v2430_v12  ;;  %v2448_v42 = vadd.f32 %v2447_v45, %v2446_v38 }
 0xa35   :  { %v2371_v10 = vpop.permute.xlu1 %2370 }
 0xa36   :  { %v2452_v48 = vrot.slane %v2451_v9, 4  ;;  %v2432_v27 = vmul.f32 %v2371_v10, %v3782_v13  ;;  %v2449_v39 = vrot.slane %v2448_v42, 1  ;;  %v2391_v13 = vpop.permute.xlu0 %2390  ;;  %v4189_v10 = vld [vmem:[#allocation24_spill] sm:$0xff] }
 0xa37   :  { %v2436_v58 = vmul.f32 %v2391_v13, %v3790_v63 }
 0xa38   :  { %v2453_v14 = vadd.f32 %v2452_v48, %v2451_v9  ;;  %v2450_v47 = vadd.f32 %v2449_v39, %v2448_v42 }
 0xa39   :  { %v2376_v29 = vpop.permute.xlu1 %2375 }
 0xa3a   :  { %v2454_v18 = vrot.slane %v2453_v14, 2  ;;  %v2433_v6 = vmul.f32 %v2376_v29, %v3786_v22  ;;  %v2426_v16 = vpop.permute.xlu0 %2425  ;;  %v4190_v29 = vld [vmem:[#allocation25_spill] sm:$0xff] }
 0xa3b   :  { %v2443_v48 = vmul.f32 %v4189_v10, %v2426_v16 }
 0xa3c   :  { %v2455_v61 = vadd.f32 %v2454_v18, %v2453_v14  ;;  %v2458_v57 = vadd.f32 %v2433_v6, %v2432_v27 }
 0xa3d   :  { %v2381_v20 = vpop.permute.xlu1 %2380 }
 0xa3e   :  { %v2456_v24 = vrot.slane %v2455_v61, 1  ;;  %v2459_v31 = vrot.slane %v2458_v57, 4  ;;  %v2434_v40 = vmul.f32 %v3780_v1, %v2381_v20 }
 0xa40   :  { %v2457_v5 = vadd.f32 %v2456_v24, %v2455_v61  ;;  %v2460_v21 = vadd.f32 %v2459_v31, %v2458_v57 }
 0xa41   :  { %v2386_v46 = vpop.permute.xlu1 %2385 }
 0xa42   :  { %v2508_v35 = vsel %vm941_vm2, %v2457_v5, %v2450_v47  ;;  %v2461_v7 = vrot.slane %v2460_v21, 2  ;;  %v2435_v4 = vmul.f32 %v3784_v15, %v2386_v46 }
 0xa44   :  { %v2462_v2 = vadd.f32 %v2461_v7, %v2460_v21  ;;  %v2465_v22 = vadd.f32 %v2435_v4, %v2434_v40  ;;  %v4191_v40 = vld [vmem:[#allocation26_spill] sm:$0xff] }
 0xa45   :  { %v2396_v25 = vpop.permute.xlu1 %2395 }
 0xa46   :  { %v2463_v28 = vrot.slane %v2462_v2, 1  ;;  %v2466_v17 = vrot.slane %v2465_v22, 4  ;;  %v2437_v32 = vmul.f32 %v2396_v25, %v3794_v44 }
 0xa48   :  { %v2464_v53 = vadd.f32 %v2463_v28, %v2462_v2  ;;  %v2467_v8 = vadd.f32 %v2466_v17, %v2465_v22  ;;  %v2472_v62 = vadd.f32 %v2437_v32, %v2436_v58 }
 0xa49   :  { %v2401_v19 = vpop.permute.xlu1 %2400 }
 0xa4a   :  { %v2509_v59 = vsel %vm943_vm3, %v2464_v53, %v2508_v35  ;;  %v2468_v55 = vrot.slane %v2467_v8, 2  ;;  %v2473_v1 = vrot.slane %v2472_v62, 4  ;;  %v2438_v26 = vmul.f32 %v3788_v41, %v2401_v19 }
 0xa4c   :  { %v2469_v49 = vadd.f32 %v2468_v55, %v2467_v8  ;;  %v2474_v15 = vadd.f32 %v2473_v1, %v2472_v62 }
 0xa4d   :  { %v2406_v23 = vpop.permute.xlu1 %2405 }
 0xa4e   :  { %v2470_v56 = vrot.slane %v2469_v49, 1  ;;  %v2475_v50 = vrot.slane %v2474_v15, 2  ;;  %v2439_v63 = vmul.f32 %v3792_v30, %v2406_v23 }
 0xa50   :  { %v2471_v54 = vadd.f32 %v2470_v56, %v2469_v49  ;;  %v2476_v33 = vadd.f32 %v2475_v50, %v2474_v15  ;;  %v2479_v44 = vadd.f32 %v2439_v63, %v2438_v26 }
 0xa51   :  { %v2411_v3 = vpop.permute.xlu1 %2410 }
 0xa52   :  { %v2477_v34 = vrot.slane %v2476_v33, 1  ;;  %v2480_v51 = vrot.slane %v2479_v44, 4  ;;  %v2510_v11 = vsel %vm945_vm4, %v2471_v54, %v2509_v59  ;;  %v2440_v43 = vmul.f32 %v2411_v3, %v3798_v37 }
 0xa54   :  { %v2478_v60 = vadd.f32 %v2477_v34, %v2476_v33  ;;  %v2481_v52 = vadd.f32 %v2480_v51, %v2479_v44 }
 0xa55   :  { %v2416_v36 = vpop.permute.xlu1 %2415 }
 0xa56   :  { %v2482_v38 = vrot.slane %v2481_v52, 2  ;;  %v2441_v12 = vmul.f32 %v2416_v36, %v3802_v0  ;;  %v2511_v41 = vsel %vm947_vm5, %v2478_v60, %v2510_v11 }
 0xa58   :  { %v2483_v30 = vadd.f32 %v2482_v38, %v2481_v52  ;;  %v2486_v45 = vadd.f32 %v2441_v12, %v2440_v43 }
 0xa59   :  { %v2421_v9 = vpop.permute.xlu1 %2420 }
 0xa5a   :  { %v2484_v42 = vrot.slane %v2483_v30, 1  ;;  %v2487_v14 = vrot.slane %v2486_v45, 4  ;;  %v2442_v18 = vmul.f32 %v4190_v29, %v2421_v9 }
 0xa5c   :  { %v2485_v27 = vadd.f32 %v2484_v42, %v2483_v30  ;;  %v2488_v6 = vadd.f32 %v2487_v14, %v2486_v45  ;;  %v2493_v39 = vadd.f32 %v2443_v48, %v2442_v18 }
 0xa5e   :  { %v2489_v61 = vrot.slane %v2488_v6, 2  ;;  %v2494_v57 = vrot.slane %v2493_v39, 4  ;;  %v2512_v37 = vsel %vm949_vm6, %v2485_v27, %v2511_v41 }
 0xa60   :  { %v2490_v0 = vadd.f32 %v2489_v61, %v2488_v6  ;;  %v2495_v20 = vadd.f32 %v2494_v57, %v2493_v39 }
 0xa62   :  { %v2491_v24 = vrot.slane %v2490_v0, 1  ;;  %v2496_v31 = vrot.slane %v2495_v20, 2 }
 0xa64   :  { %v2492_v47 = vadd.f32 %v2491_v24, %v2490_v0  ;;  %v2497_v5 = vadd.f32 %v2496_v31, %v2495_v20 }
 0xa66   :  { %v2498_v21 = vrot.slane %v2497_v5, 1  ;;  %v2513_v46 = vsel %vm951_vm7, %v2492_v47, %v2512_v37 }
 0xa68   :  { %v2499_v35 = vadd.f32 %v2498_v21, %v2497_v5 }
 0xa6a   :  { %v2514_v7 = vsel %vm953_vm8, %v2499_v35, %v2513_v46 }
 0xa6b   :  { %v2516_v4 = vadd.f32 %v2514_v7, %v4191_v40 }
 0xa6d   :  { %2517 = vst [vmem:[#allocation16] sm:$0xff] %v2516_v4 }
 0xa6e   :  { %3109 = shalt.err (!%p3106_p9)
}
 0xa6f   :  { %s3110_s3 = scalar_lea.hbm %s4116_s12, 128 }
 0xa70   :  { %p3111_p10 = scmp.ne.s32.totalorder %s4116_s12, %s3110_s3  ;;  %p3114_p11 = scmp.lt.u32.totalorder %s3110_s3, %s4116_s12 }
 0xa72   :  { %p3116_p12 = pnand %p3114_p11, %p3111_p10 }
 0xa74   :  { %3119 = shalt.err (!%p3116_p12)
}
 0xa75   :  { %2527 = dma.vmem_to_hbm [thread:$0]  %s2525_s20, 128, %s4116_s12, [#allocation4]  }
 0xa76   :  { %3130 = dma.done.wait [#allocation4], 128  }
 0xa77   :  { %3131 = vsyncadd [#allocation4], 4294967168 }
 0xa78   :  { %2531 = vsyncpa [#allocation3], 1 }
 0xa79   :  { %2532 = vsyncpa [#allocation7], 1 }
 0xa7a   :  { %2533 = vsyncpa [#allocation10], 1 }
 0xa7b   :  { %2534 = vsyncpa [#allocation13], 1 }
 0xa7c   :  { %2535 = vsyncpa [#allocation4], 1 }
 0xa7d   :  { %2536 = vsyncpa [#allocation5], 1 }

</bundles_post_ra>
